<compile_context>
chip_gen: v7x
topology: tpu7x:2x2x1
jax: 0.10.0
libtpu: 0.0.40
codegen_flags: <defaults>
</compile_context>

<pallas_src>
import functools
import math

import numpy as np
import jax
import jax.numpy as jnp
from jax.experimental import pallas as pl
from jax.experimental.pallas import tpu as pltpu

# ----------------------------- config ---------------------------------------
INPUT_SIZE = 5
DIN_PAD = 8                    # input feature dim zero-padded to 8 lanes
HIDDEN = 64
NUM_HEADS = 4
HEAD_DIM = HIDDEN // NUM_HEADS
OUTPUT_SIZE = 1
BATCH = 2
SEQ = 8

# Row offsets of each section inside the packed weight matrix (multiples of 16,
# so slices are sublane-tile aligned for both f32 and bf16 packs).
_W_IH_ROW = 0      # (DIN_PAD, 4H)  LSTM W_ih^T, gate cols (i, f, o, g), rows Din.. zero
_W_HH_ROW = 16     # (H, 4H)        LSTM W_hh^T, gate cols (i, f, o, g)
_W_ATTN_ROW = 80   # (H, 4H)        [Wq^T*scale | Wk^T | Wv^T | Wo^T]
_W_ROWS = 144


# ----------------------------- kernel ---------------------------------------
def tft_kernel(x_ref, w_ref, c_ref, out_ref, gin_ref, lo_ref, *, matmul_dtype):
    # x_ref : (T*BB, DIN_PAD) f32   time-major rows within the block (row = t*BB + b)
    # w_ref : (_W_ROWS, 4H)  md     packed matmul weights (see offsets above)
    # c_ref : (8, 4H)        f32    packed constants:
    #           row 0: LSTM bias (i,f,o,g);  row 1: [bq*s | bk | bv | bo]
    #           row 2 lanes 0:H: output weight row;  row 3: output bias (broadcast)
    # out_ref: (1, BB) f32          lane-dense output row for this block
    # gin_ref: (T*BB, 4H) f32 scratch — staged input-gate projections
    # lo_ref : (T*BB, H)  f32 scratch — LSTM hidden states, time-major rows
    f32 = jnp.float32
    md = matmul_dtype
    TB = x_ref.shape[0]
    BB = out_ref.shape[1]
    T = TB // BB
    H = lo_ref.shape[1]
    NH = NUM_HEADS
    HD = H // NH

    cpk = c_ref[...]                                           # (8, 4H) f32

    # ---- LSTM input projection for all timesteps at once (one MXU pass), ----
    # ---- staged to VMEM so the recurrence only keeps one (BB, 4H) slab live. -
    gin_ref[...] = (
        jnp.dot(x_ref[...].astype(md),
                w_ref[_W_IH_ROW:_W_IH_ROW + DIN_PAD, :],
                preferred_element_type=f32)
        + cpk[0:1, :]
    )

    # ---- recurrence: only h @ W_hh stays on the serial path; W_hh loaded once.
    whh = w_ref[_W_HH_ROW:_W_HH_ROW + H, :]                    # (H, 4H) in md
    h = jnp.zeros((BB, H), f32)
    c_state = jnp.zeros((BB, H), f32)
    for t in range(T):          # short static loop (T == 8), fully unrolled
        gates = gin_ref[pl.ds(t * BB, BB), :] + jnp.dot(
            h.astype(md), whh, preferred_element_type=f32)     # (BB, 4H)
        sig = jax.nn.sigmoid(gates[:, : 3 * H])                # i, f, o in one EUP slab
        g_g = jnp.tanh(gates[:, 3 * H:])                       # g gate
        i_g = sig[:, :H]
        f_g = sig[:, H:2 * H]
        o_g = sig[:, 2 * H:3 * H]
        c_state = f_g * c_state + i_g * g_g                    # cell math stays f32
        h = o_g * jnp.tanh(c_state)
        lo_ref[pl.ds(t * BB, BB), :] = h                       # contiguous row block
    # NOTE(perf): on v6e/v7x the gate transcendentals (EUP) become the per-step
    # floor at large BB; bf16 activations would ~2x that unit but are kept f32
    # here for numerical headroom.

    # ---- multi-head self-attention, last query only, all heads at once ------
    w_attn = w_ref[_W_ATTN_ROW:_W_ATTN_ROW + H, :]             # (H, 4H) in md
    lo = lo_ref[...]                                           # (TB, H) f32
    q = jnp.dot(h.astype(md), w_attn[:, :H],
                preferred_element_type=f32) + cpk[1:2, :H]                   # (BB, H)
    kv = jnp.dot(lo.astype(md), w_attn[:, H:3 * H],
                 preferred_element_type=f32) + cpk[1:2, H:3 * H]             # (TB, 2H)
    k = kv[:, :H]
    v = kv[:, H:]

    # q replicated over the T row blocks via a broadcast (no MXU pass, no rep input).
    q_tiled = jnp.broadcast_to(q[None], (T, BB, H)).reshape(TB, H)

    # Per-head score reduction with a one-hot matrix built in-kernel (iota);
    # kept as a tiny K=H MXU op (off the serial path) for lowering safety.
    d_i = jax.lax.broadcasted_iota(jnp.int32, (H, NH), 0)
    n_i = jax.lax.broadcasted_iota(jnp.int32, (H, NH), 1)
    hsum = ((d_i >= n_i * HD) & (d_i < (n_i + 1) * HD)).astype(f32)          # (H, NH)
    s = jnp.dot(q_tiled * k, hsum, preferred_element_type=f32)               # (TB, NH)

    # Softmax over T for every (batch, head) pair at once.  BB is a multiple of 8,
    # so the (TB, .) <-> (T, BB, .) reshapes are sublane-tile aligned (free views).
    s3 = s.reshape(T, BB, NH)
    m = jnp.max(s3, axis=0, keepdims=True)
    e = jnp.exp(s3 - m)
    denom = jnp.sum(e, axis=0, keepdims=True)
    w3 = e * pl.reciprocal(denom, approx=True)                               # (T, BB, NH)

    # Broadcast each head weight over its HD lanes (one-hot), weight V, reduce over T.
    n_j = jax.lax.broadcasted_iota(jnp.int32, (NH, H), 0)
    d_j = jax.lax.broadcasted_iota(jnp.int32, (NH, H), 1)
    hbc = ((d_j >= n_j * HD) & (d_j < (n_j + 1) * HD)).astype(f32)           # (NH, H)
    w_full = jnp.dot(w3.reshape(TB, NH), hbc, preferred_element_type=f32)    # (TB, H)
    ctx = jnp.sum((w_full * v).reshape(T, BB, H), axis=0)                    # (BB, H)

    attn = jnp.dot(ctx.astype(md), w_attn[:, 3 * H:],
                   preferred_element_type=f32) + cpk[1:2, 3 * H:]            # (BB, H)

    # Dropout(p=0.1) is identity in eval mode.
    # TODO(synk): training-mode dropout (pltpu.prng_* masking) not reproduced.

    # Final Linear(H, 1), emitted lane-dense as a (1, BB) row:
    #   out[0, b] = sum_d attn[b, d] * wout[d] + bout
    out_ref[...] = jax.lax.dot_general(
        cpk[2:3, :H], attn, (((1,), (1,)), ((), ())),
        preferred_element_type=f32) + cpk[3:4, 0:1]


# ----------------------------- host-side param packing -----------------------
def _reorder_gates(w):  # gate columns (i, f, g, o) -> (i, f, o, g)
    i, f, g, o = jnp.split(w, 4, axis=-1)
    return jnp.concatenate([i, f, o, g], axis=-1)


def pack_params(params, matmul_dtype):
    H = HIDDEN
    scale = 1.0 / math.sqrt(HEAD_DIM)

    wpack = jnp.zeros((_W_ROWS, 4 * H), jnp.float32)
    wpack = wpack.at[_W_IH_ROW:_W_IH_ROW + INPUT_SIZE, :].set(
        _reorder_gates(params["wih_t"]))
    wpack = wpack.at[_W_HH_ROW:_W_HH_ROW + H, :].set(_reorder_gates(params["whh_t"]))
    w_attn = jnp.concatenate(
        [params["wq_t"] * scale, params["wk_t"], params["wv_t"], params["wo_t"]],
        axis=1)
    wpack = wpack.at[_W_ATTN_ROW:_W_ATTN_ROW + H, :].set(w_attn)

    cpack = jnp.zeros((8, 4 * H), jnp.float32)
    cpack = cpack.at[0:1, :].set(_reorder_gates(params["b_lstm"]))
    b_attn = jnp.concatenate(
        [params["bq"] * scale, params["bk"], params["bv"], params["bo"]], axis=1)
    cpack = cpack.at[1:2, :].set(b_attn)
    cpack = cpack.at[2:3, :H].set(params["wout_t"].T)       # output weight row
    cpack = cpack.at[3:4, :].set(params["bout"][0, 0])      # output bias (broadcast)
    return wpack.astype(matmul_dtype), cpack


# ----------------------------- wrapper ---------------------------------------
def _pick_batch_block(B):
    # One big block (up to 256 MXU rows) on a single TensorCore; larger batches
    # split into several "parallel" grid steps (also lets v7x's 2 TCs shard the grid).
    if B <= 256:
        return B
    for bb in range(256, 0, -1):
        if B % bb == 0:
            return bb
    return B


def tft_stub_forward(x, params, *, batch_block=None, matmul_dtype=jnp.bfloat16):
    B, T, Din = x.shape
    assert Din == INPUT_SIZE and Din <= DIN_PAD
    BB = _pick_batch_block(B) if batch_block is None else batch_block
    assert B % BB == 0, "batch must be divisible by the batch block"
    NB = B // BB
    # Round the in-kernel block up to a sublane multiple (8); padded rows carry
    # zeros and their outputs are dropped. Keeps every BlockSpec / reshape aligned.
    BBp = -(-BB // 8) * 8
    TB = T * BBp

    wpack, cpack = pack_params(params, matmul_dtype)

    # Batch-blocked, time-major activation layout: row (t*BBp + b_local) within block.
    xp = jnp.pad(x.astype(jnp.float32), ((0, 0), (0, 0), (0, DIN_PAD - Din)))
    xb = xp.reshape(NB, BB, T, DIN_PAD)
    xb = jnp.pad(xb, ((0, 0), (0, BBp - BB), (0, 0), (0, 0)))
    x_blk = xb.transpose(0, 2, 1, 3).reshape(NB, TB, DIN_PAD)

    kernel = functools.partial(tft_kernel, matmul_dtype=matmul_dtype)

    # VMEM budget per grid step (f32): gate scratch T*BBp*4H*4 + lstm-out T*BBp*H*4
    # + double-buffered x block + ~150 KB packed weights; at BBp=256 that is ~2.7 MB,
    # far below the 32 MB default scoped limit on every generation (v7x: 64 MB phys).
    out = pl.pallas_call(
        kernel,
        out_shape=jax.ShapeDtypeStruct((NB, 1, BBp), jnp.float32),
        grid=(NB,),
        in_specs=[
            pl.BlockSpec((None, TB, DIN_PAD), lambda i: (i, 0, 0)),
            pl.BlockSpec(wpack.shape, lambda i: (0, 0)),   # resident across grid steps
            pl.BlockSpec(cpack.shape, lambda i: (0, 0)),   # resident across grid steps
        ],
        out_specs=pl.BlockSpec((None, 1, BBp), lambda i: (i, 0, 0)),
        scratch_shapes=[
            pltpu.VMEM((TB, 4 * HIDDEN), jnp.float32),     # staged input gates
            pltpu.VMEM((TB, HIDDEN), jnp.float32),         # LSTM hidden states
        ],
        compiler_params=pltpu.CompilerParams(
            dimension_semantics=("parallel",)),
    )(x_blk, wpack, cpack)

    return out[:, 0, :BB].reshape(B, OUTPUT_SIZE)


# ----------------------------- reference (pure JAX) ---------------------------
def tft_stub_reference(x, params):
    B, T, _ = x.shape
    H = HIDDEN
    h = jnp.zeros((B, H), jnp.float32)
    c = jnp.zeros((B, H), jnp.float32)
    hs = []
    for t in range(T):
        gates = x[:, t, :] @ params["wih_t"] + h @ params["whh_t"] + params["b_lstm"]
        i_g = jax.nn.sigmoid(gates[:, 0:H])
        f_g = jax.nn.sigmoid(gates[:, H:2 * H])
        g_g = jnp.tanh(gates[:, 2 * H:3 * H])
        o_g = jax.nn.sigmoid(gates[:, 3 * H:4 * H])
        c = f_g * c + i_g * g_g
        h = o_g * jnp.tanh(c)
        hs.append(h)
    lo = jnp.stack(hs, axis=1)                                   # (B, T, H)

    q = h @ params["wq_t"] + params["bq"]                        # last-row query
    k = lo @ params["wk_t"] + params["bk"]
    v = lo @ params["wv_t"] + params["bv"]

    qh = q.reshape(B, NUM_HEADS, HEAD_DIM)
    kh = k.reshape(B, T, NUM_HEADS, HEAD_DIM)
    vh = v.reshape(B, T, NUM_HEADS, HEAD_DIM)
    s = jnp.einsum("bnd,btnd->bnt", qh, kh) / math.sqrt(HEAD_DIM)
    w = jax.nn.softmax(s, axis=-1)
    ctx = jnp.einsum("bnt,btnd->bnd", w, vh).reshape(B, HIDDEN)
    attn = ctx @ params["wo_t"] + params["bo"]
    return attn @ params["wout_t"] + params["bout"]


# ----------------------------- parameter init --------------------------------
def init_params(key):
    ks = jax.random.split(key, 16)
    H, Din = HIDDEN, INPUT_SIZE
    u = lambda k, shape, s: jax.random.uniform(k, shape, jnp.float32, -s, s)
    s_lstm = 1.0 / math.sqrt(H)
    s_attn = 1.0 / math.sqrt(H)
    return {
        "wih_t": u(ks[0], (Din, 4 * H), s_lstm),
        "whh_t": u(ks[1], (H, 4 * H), s_lstm),
        "b_lstm": u(ks[2], (1, 4 * H), s_lstm) + u(ks[3], (1, 4 * H), s_lstm),
        "wq_t": u(ks[4], (H, H), s_attn),
        "wk_t": u(ks[5], (H, H), s_attn),
        "wv_t": u(ks[6], (H, H), s_attn),
        "bq": u(ks[7], (1, H), s_attn),
        "bk": u(ks[8], (1, H), s_attn),
        "bv": u(ks[9], (1, H), s_attn),
        "wo_t": u(ks[10], (H, H), s_attn),
        "bo": u(ks[11], (1, H), s_attn),
        "wout_t": u(ks[12], (H, OUTPUT_SIZE), s_attn),
        "bout": u(ks[13], (1, OUTPUT_SIZE), s_attn),
    }


# ----------------------------- main ------------------------------------------
if __name__ == "__main__":
    key = jax.random.PRNGKey(0)
    k_x, k_p = jax.random.split(key)
    x = jax.random.normal(k_x, (BATCH, SEQ, INPUT_SIZE), jnp.float32)
    params = init_params(k_p)

    ref = tft_stub_reference(x, params)

    # Exact-precision path (f32 MXU operands): tight structural check.
    out_f32 = jax.block_until_ready(
        tft_stub_forward(x, params, matmul_dtype=jnp.float32))
    np.testing.assert_allclose(np.asarray(out_f32), np.asarray(ref),
                               rtol=1e-2, atol=2e-3)

    # Default fast path (bf16 MXU operands, f32 accumulation / cell state):
    # tolerance widened for bf16 rounding + the approximate softmax reciprocal.
    out = jax.block_until_ready(tft_stub_forward(x, params))
    np.testing.assert_allclose(np.asarray(out), np.asarray(ref),
                               rtol=5e-2, atol=3e-2)

    assert out.shape == (BATCH, OUTPUT_SIZE)
    print("KERNEL_OK")
</pallas_src>

<mosaic_0001>
module attributes {stable_mosaic.version = 11 : i64} {
  func.func @tft_kernel(%arg0: i32, %arg1: memref<1x64x8xf32, #tpu.memory_space<vmem>>, %arg2: memref<144x256xf32, #tpu.memory_space<vmem>>, %arg3: memref<8x256xf32, #tpu.memory_space<vmem>>, %arg4: memref<1x1x8xf32, #tpu.memory_space<vmem>>, %arg5: memref<64x256xf32, #tpu.memory_space<vmem>>, %arg6: memref<64x64xf32, #tpu.memory_space<vmem>>) attributes {dimension_semantics = [#tpu.dimension_semantics<parallel>], iteration_bounds = array<i64: 1>, scalar_prefetch = 0 : i64, scratch_operands = 2 : i64, tpu.core_type = #tpu.core_type<tc>, window_params = [{transform_indices = @transform_0, window_bounds = array<i64: 1, 64, 8>}, {pipeline_mode = #tpu.pipeline_mode<synchronous>, transform_indices = @transform_1, window_bounds = array<i64: 144, 256>}, {pipeline_mode = #tpu.pipeline_mode<synchronous>, transform_indices = @transform_2, window_bounds = array<i64: 8, 256>}, {transform_indices = @transform_3, window_bounds = array<i64: 1, 1, 8>}]} {
    %c0 = arith.constant 0 : index
    %c0_0 = arith.constant 0 : index
    %0 = vector.load %arg3[%c0, %c0_0] : memref<8x256xf32, #tpu.memory_space<vmem>>, vector<8x256xf32>
    %c0_1 = arith.constant 0 : index
    %c0_2 = arith.constant 0 : index
    %c0_3 = arith.constant 0 : index
    %1 = vector.load %arg1[%c0_1, %c0_2, %c0_3] : memref<1x64x8xf32, #tpu.memory_space<vmem>>, vector<1x64x8xf32>
    %2 = vector.shape_cast %1 : vector<1x64x8xf32> to vector<64x8xf32>
    %c0_4 = arith.constant 0 : index
    %c0_5 = arith.constant 0 : index
    %3 = vector.load %arg2[%c0_4, %c0_5] : memref<144x256xf32, #tpu.memory_space<vmem>>, vector<8x256xf32>
    %cst = arith.constant dense<0.000000e+00> : vector<64x256xf32>
    %4 = tpu.matmul %2, %3, %cst {dimension_numbers = #tpu.dot_dimension_numbers<[1], [0], [0], [1], [0, 0, 1, 1], [], []>} : vector<64x8xf32>, vector<8x256xf32>, vector<64x256xf32> -> vector<64x256xf32>
    %5 = vector.extract_strided_slice %0 {offsets = [0, 0], sizes = [1, 256], strides = [1, 1]} : vector<8x256xf32> to vector<1x256xf32>
    %6 = vector.broadcast %5 : vector<1x256xf32> to vector<64x256xf32>
    %7 = arith.addf %4, %6 : vector<64x256xf32>
    %c0_6 = arith.constant 0 : index
    %c0_7 = arith.constant 0 : index
    %8 = vector.load %arg5[%c0_6, %c0_7] : memref<64x256xf32, #tpu.memory_space<vmem>>, vector<64x256xf32>
    tpu.vector_store %arg5[%c0_6, %c0_7], %7 {strides = array<i32>} : memref<64x256xf32, #tpu.memory_space<vmem>>, vector<64x256xf32>,
    %c16 = arith.constant 16 : index
    %c0_8 = arith.constant 0 : index
    %9 = vector.load %arg2[%c16, %c0_8] : memref<144x256xf32, #tpu.memory_space<vmem>>, vector<64x256xf32>
    %cst_9 = arith.constant 0.000000e+00 : f32
    %10 = vector.broadcast %cst_9 : f32 to vector<8x64xf32>
    %cst_10 = arith.constant 0.000000e+00 : f32
    %11 = vector.broadcast %cst_10 : f32 to vector<8x64xf32>
    %c0_11 = arith.constant 0 : index
    %c0_12 = arith.constant 0 : index
    %12 = vector.load %arg5[%c0_11, %c0_12] : memref<64x256xf32, #tpu.memory_space<vmem>>, vector<8x256xf32>
    %cst_13 = arith.constant dense<0.000000e+00> : vector<8x256xf32>
    %13 = tpu.matmul %10, %9, %cst_13 {dimension_numbers = #tpu.dot_dimension_numbers<[1], [0], [0], [1], [0, 0, 1, 1], [], []>} : vector<8x64xf32>, vector<64x256xf32>, vector<8x256xf32> -> vector<8x256xf32>
    %14 = arith.addf %12, %13 : vector<8x256xf32>
    %15 = vector.extract_strided_slice %14 {offsets = [0, 0], sizes = [8, 192], strides = [1, 1]} : vector<8x256xf32> to vector<8x192xf32>
    %16 = arith.negf %15 : vector<8x192xf32>
    %17 = math.exp %16 : vector<8x192xf32>
    %cst_14 = arith.constant 1.000000e+00 : f32
    %18 = vector.broadcast %cst_14 : f32 to vector<8x192xf32>
    %19 = arith.addf %18, %17 : vector<8x192xf32>
    %20 = arith.divf %18, %19 : vector<8x192xf32>
    %21 = vector.extract_strided_slice %14 {offsets = [0, 192], sizes = [8, 64], strides = [1, 1]} : vector<8x256xf32> to vector<8x64xf32>
    %22 = math.tanh %21 : vector<8x64xf32>
    %23 = vector.extract_strided_slice %20 {offsets = [0, 0], sizes = [8, 64], strides = [1, 1]} : vector<8x192xf32> to vector<8x64xf32>
    %24 = vector.extract_strided_slice %20 {offsets = [0, 64], sizes = [8, 64], strides = [1, 1]} : vector<8x192xf32> to vector<8x64xf32>
    %25 = vector.extract_strided_slice %20 {offsets = [0, 128], sizes = [8, 64], strides = [1, 1]} : vector<8x192xf32> to vector<8x64xf32>
    %26 = arith.mulf %24, %11 : vector<8x64xf32>
    %27 = arith.mulf %23, %22 : vector<8x64xf32>
    %28 = arith.addf %26, %27 : vector<8x64xf32>
    %29 = math.tanh %28 : vector<8x64xf32>
    %30 = arith.mulf %25, %29 : vector<8x64xf32>
    %c0_15 = arith.constant 0 : index
    %c0_16 = arith.constant 0 : index
    %31 = vector.load %arg6[%c0_15, %c0_16] : memref<64x64xf32, #tpu.memory_space<vmem>>, vector<8x64xf32>
    tpu.vector_store %arg6[%c0_15, %c0_16], %30 {strides = array<i32>} : memref<64x64xf32, #tpu.memory_space<vmem>>, vector<8x64xf32>,
    %c8 = arith.constant 8 : index
    %c0_17 = arith.constant 0 : index
    %32 = vector.load %arg5[%c8, %c0_17] : memref<64x256xf32, #tpu.memory_space<vmem>>, vector<8x256xf32>
    %cst_18 = arith.constant dense<0.000000e+00> : vector<8x256xf32>
    %33 = tpu.matmul %30, %9, %cst_18 {dimension_numbers = #tpu.dot_dimension_numbers<[1], [0], [0], [1], [0, 0, 1, 1], [], []>} : vector<8x64xf32>, vector<64x256xf32>, vector<8x256xf32> -> vector<8x256xf32>
    %34 = arith.addf %32, %33 : vector<8x256xf32>
    %35 = vector.extract_strided_slice %34 {offsets = [0, 0], sizes = [8, 192], strides = [1, 1]} : vector<8x256xf32> to vector<8x192xf32>
    %36 = arith.negf %35 : vector<8x192xf32>
    %37 = math.exp %36 : vector<8x192xf32>
    %cst_19 = arith.constant 1.000000e+00 : f32
    %38 = vector.broadcast %cst_19 : f32 to vector<8x192xf32>
    %39 = arith.addf %38, %37 : vector<8x192xf32>
    %40 = arith.divf %38, %39 : vector<8x192xf32>
    %41 = vector.extract_strided_slice %34 {offsets = [0, 192], sizes = [8, 64], strides = [1, 1]} : vector<8x256xf32> to vector<8x64xf32>
    %42 = math.tanh %41 : vector<8x64xf32>
    %43 = vector.extract_strided_slice %40 {offsets = [0, 0], sizes = [8, 64], strides = [1, 1]} : vector<8x192xf32> to vector<8x64xf32>
    %44 = vector.extract_strided_slice %40 {offsets = [0, 64], sizes = [8, 64], strides = [1, 1]} : vector<8x192xf32> to vector<8x64xf32>
    %45 = vector.extract_strided_slice %40 {offsets = [0, 128], sizes = [8, 64], strides = [1, 1]} : vector<8x192xf32> to vector<8x64xf32>
    %46 = arith.mulf %44, %28 : vector<8x64xf32>
    %47 = arith.mulf %43, %42 : vector<8x64xf32>
    %48 = arith.addf %46, %47 : vector<8x64xf32>
    %49 = math.tanh %48 : vector<8x64xf32>
    %50 = arith.mulf %45, %49 : vector<8x64xf32>
    %c8_20 = arith.constant 8 : index
    %c0_21 = arith.constant 0 : index
    %51 = vector.load %arg6[%c8_20, %c0_21] : memref<64x64xf32, #tpu.memory_space<vmem>>, vector<8x64xf32>
    tpu.vector_store %arg6[%c8_20, %c0_21], %50 {strides = array<i32>} : memref<64x64xf32, #tpu.memory_space<vmem>>, vector<8x64xf32>,
    %c16_22 = arith.constant 16 : index
    %c0_23 = arith.constant 0 : index
    %52 = vector.load %arg5[%c16_22, %c0_23] : memref<64x256xf32, #tpu.memory_space<vmem>>, vector<8x256xf32>
    %cst_24 = arith.constant dense<0.000000e+00> : vector<8x256xf32>
    %53 = tpu.matmul %50, %9, %cst_24 {dimension_numbers = #tpu.dot_dimension_numbers<[1], [0], [0], [1], [0, 0, 1, 1], [], []>} : vector<8x64xf32>, vector<64x256xf32>, vector<8x256xf32> -> vector<8x256xf32>
    %54 = arith.addf %52, %53 : vector<8x256xf32>
    %55 = vector.extract_strided_slice %54 {offsets = [0, 0], sizes = [8, 192], strides = [1, 1]} : vector<8x256xf32> to vector<8x192xf32>
    %56 = arith.negf %55 : vector<8x192xf32>
    %57 = math.exp %56 : vector<8x192xf32>
    %cst_25 = arith.constant 1.000000e+00 : f32
    %58 = vector.broadcast %cst_25 : f32 to vector<8x192xf32>
    %59 = arith.addf %58, %57 : vector<8x192xf32>
    %60 = arith.divf %58, %59 : vector<8x192xf32>
    %61 = vector.extract_strided_slice %54 {offsets = [0, 192], sizes = [8, 64], strides = [1, 1]} : vector<8x256xf32> to vector<8x64xf32>
    %62 = math.tanh %61 : vector<8x64xf32>
    %63 = vector.extract_strided_slice %60 {offsets = [0, 0], sizes = [8, 64], strides = [1, 1]} : vector<8x192xf32> to vector<8x64xf32>
    %64 = vector.extract_strided_slice %60 {offsets = [0, 64], sizes = [8, 64], strides = [1, 1]} : vector<8x192xf32> to vector<8x64xf32>
    %65 = vector.extract_strided_slice %60 {offsets = [0, 128], sizes = [8, 64], strides = [1, 1]} : vector<8x192xf32> to vector<8x64xf32>
    %66 = arith.mulf %64, %48 : vector<8x64xf32>
    %67 = arith.mulf %63, %62 : vector<8x64xf32>
    %68 = arith.addf %66, %67 : vector<8x64xf32>
    %69 = math.tanh %68 : vector<8x64xf32>
    %70 = arith.mulf %65, %69 : vector<8x64xf32>
    %c16_26 = arith.constant 16 : index
    %c0_27 = arith.constant 0 : index
    %71 = vector.load %arg6[%c16_26, %c0_27] : memref<64x64xf32, #tpu.memory_space<vmem>>, vector<8x64xf32>
    tpu.vector_store %arg6[%c16_26, %c0_27], %70 {strides = array<i32>} : memref<64x64xf32, #tpu.memory_space<vmem>>, vector<8x64xf32>,
    %c24 = arith.constant 24 : index
    %c0_28 = arith.constant 0 : index
    %72 = vector.load %arg5[%c24, %c0_28] : memref<64x256xf32, #tpu.memory_space<vmem>>, vector<8x256xf32>
    %cst_29 = arith.constant dense<0.000000e+00> : vector<8x256xf32>
    %73 = tpu.matmul %70, %9, %cst_29 {dimension_numbers = #tpu.dot_dimension_numbers<[1], [0], [0], [1], [0, 0, 1, 1], [], []>} : vector<8x64xf32>, vector<64x256xf32>, vector<8x256xf32> -> vector<8x256xf32>
    %74 = arith.addf %72, %73 : vector<8x256xf32>
    %75 = vector.extract_strided_slice %74 {offsets = [0, 0], sizes = [8, 192], strides = [1, 1]} : vector<8x256xf32> to vector<8x192xf32>
    %76 = arith.negf %75 : vector<8x192xf32>
    %77 = math.exp %76 : vector<8x192xf32>
    %cst_30 = arith.constant 1.000000e+00 : f32
    %78 = vector.broadcast %cst_30 : f32 to vector<8x192xf32>
    %79 = arith.addf %78, %77 : vector<8x192xf32>
    %80 = arith.divf %78, %79 : vector<8x192xf32>
    %81 = vector.extract_strided_slice %74 {offsets = [0, 192], sizes = [8, 64], strides = [1, 1]} : vector<8x256xf32> to vector<8x64xf32>
    %82 = math.tanh %81 : vector<8x64xf32>
    %83 = vector.extract_strided_slice %80 {offsets = [0, 0], sizes = [8, 64], strides = [1, 1]} : vector<8x192xf32> to vector<8x64xf32>
    %84 = vector.extract_strided_slice %80 {offsets = [0, 64], sizes = [8, 64], strides = [1, 1]} : vector<8x192xf32> to vector<8x64xf32>
    %85 = vector.extract_strided_slice %80 {offsets = [0, 128], sizes = [8, 64], strides = [1, 1]} : vector<8x192xf32> to vector<8x64xf32>
    %86 = arith.mulf %84, %68 : vector<8x64xf32>
    %87 = arith.mulf %83, %82 : vector<8x64xf32>
    %88 = arith.addf %86, %87 : vector<8x64xf32>
    %89 = math.tanh %88 : vector<8x64xf32>
    %90 = arith.mulf %85, %89 : vector<8x64xf32>
    %c24_31 = arith.constant 24 : index
    %c0_32 = arith.constant 0 : index
    %91 = vector.load %arg6[%c24_31, %c0_32] : memref<64x64xf32, #tpu.memory_space<vmem>>, vector<8x64xf32>
    tpu.vector_store %arg6[%c24_31, %c0_32], %90 {strides = array<i32>} : memref<64x64xf32, #tpu.memory_space<vmem>>, vector<8x64xf32>,
    %c32 = arith.constant 32 : index
    %c0_33 = arith.constant 0 : index
    %92 = vector.load %arg5[%c32, %c0_33] : memref<64x256xf32, #tpu.memory_space<vmem>>, vector<8x256xf32>
    %cst_34 = arith.constant dense<0.000000e+00> : vector<8x256xf32>
    %93 = tpu.matmul %90, %9, %cst_34 {dimension_numbers = #tpu.dot_dimension_numbers<[1], [0], [0], [1], [0, 0, 1, 1], [], []>} : vector<8x64xf32>, vector<64x256xf32>, vector<8x256xf32> -> vector<8x256xf32>
    %94 = arith.addf %92, %93 : vector<8x256xf32>
    %95 = vector.extract_strided_slice %94 {offsets = [0, 0], sizes = [8, 192], strides = [1, 1]} : vector<8x256xf32> to vector<8x192xf32>
    %96 = arith.negf %95 : vector<8x192xf32>
    %97 = math.exp %96 : vector<8x192xf32>
    %cst_35 = arith.constant 1.000000e+00 : f32
    %98 = vector.broadcast %cst_35 : f32 to vector<8x192xf32>
    %99 = arith.addf %98, %97 : vector<8x192xf32>
    %100 = arith.divf %98, %99 : vector<8x192xf32>
    %101 = vector.extract_strided_slice %94 {offsets = [0, 192], sizes = [8, 64], strides = [1, 1]} : vector<8x256xf32> to vector<8x64xf32>
    %102 = math.tanh %101 : vector<8x64xf32>
    %103 = vector.extract_strided_slice %100 {offsets = [0, 0], sizes = [8, 64], strides = [1, 1]} : vector<8x192xf32> to vector<8x64xf32>
    %104 = vector.extract_strided_slice %100 {offsets = [0, 64], sizes = [8, 64], strides = [1, 1]} : vector<8x192xf32> to vector<8x64xf32>
    %105 = vector.extract_strided_slice %100 {offsets = [0, 128], sizes = [8, 64], strides = [1, 1]} : vector<8x192xf32> to vector<8x64xf32>
    %106 = arith.mulf %104, %88 : vector<8x64xf32>
    %107 = arith.mulf %103, %102 : vector<8x64xf32>
    %108 = arith.addf %106, %107 : vector<8x64xf32>
    %109 = math.tanh %108 : vector<8x64xf32>
    %110 = arith.mulf %105, %109 : vector<8x64xf32>
    %c32_36 = arith.constant 32 : index
    %c0_37 = arith.constant 0 : index
    %111 = vector.load %arg6[%c32_36, %c0_37] : memref<64x64xf32, #tpu.memory_space<vmem>>, vector<8x64xf32>
    tpu.vector_store %arg6[%c32_36, %c0_37], %110 {strides = array<i32>} : memref<64x64xf32, #tpu.memory_space<vmem>>, vector<8x64xf32>,
    %c40 = arith.constant 40 : index
    %c0_38 = arith.constant 0 : index
    %112 = vector.load %arg5[%c40, %c0_38] : memref<64x256xf32, #tpu.memory_space<vmem>>, vector<8x256xf32>
    %cst_39 = arith.constant dense<0.000000e+00> : vector<8x256xf32>
    %113 = tpu.matmul %110, %9, %cst_39 {dimension_numbers = #tpu.dot_dimension_numbers<[1], [0], [0], [1], [0, 0, 1, 1], [], []>} : vector<8x64xf32>, vector<64x256xf32>, vector<8x256xf32> -> vector<8x256xf32>
    %114 = arith.addf %112, %113 : vector<8x256xf32>
    %115 = vector.extract_strided_slice %114 {offsets = [0, 0], sizes = [8, 192], strides = [1, 1]} : vector<8x256xf32> to vector<8x192xf32>
    %116 = arith.negf %115 : vector<8x192xf32>
    %117 = math.exp %116 : vector<8x192xf32>
    %cst_40 = arith.constant 1.000000e+00 : f32
    %118 = vector.broadcast %cst_40 : f32 to vector<8x192xf32>
    %119 = arith.addf %118, %117 : vector<8x192xf32>
    %120 = arith.divf %118, %119 : vector<8x192xf32>
    %121 = vector.extract_strided_slice %114 {offsets = [0, 192], sizes = [8, 64], strides = [1, 1]} : vector<8x256xf32> to vector<8x64xf32>
    %122 = math.tanh %121 : vector<8x64xf32>
    %123 = vector.extract_strided_slice %120 {offsets = [0, 0], sizes = [8, 64], strides = [1, 1]} : vector<8x192xf32> to vector<8x64xf32>
    %124 = vector.extract_strided_slice %120 {offsets = [0, 64], sizes = [8, 64], strides = [1, 1]} : vector<8x192xf32> to vector<8x64xf32>
    %125 = vector.extract_strided_slice %120 {offsets = [0, 128], sizes = [8, 64], strides = [1, 1]} : vector<8x192xf32> to vector<8x64xf32>
    %126 = arith.mulf %124, %108 : vector<8x64xf32>
    %127 = arith.mulf %123, %122 : vector<8x64xf32>
    %128 = arith.addf %126, %127 : vector<8x64xf32>
    %129 = math.tanh %128 : vector<8x64xf32>
    %130 = arith.mulf %125, %129 : vector<8x64xf32>
    %c40_41 = arith.constant 40 : index
    %c0_42 = arith.constant 0 : index
    %131 = vector.load %arg6[%c40_41, %c0_42] : memref<64x64xf32, #tpu.memory_space<vmem>>, vector<8x64xf32>
    tpu.vector_store %arg6[%c40_41, %c0_42], %130 {strides = array<i32>} : memref<64x64xf32, #tpu.memory_space<vmem>>, vector<8x64xf32>,
    %c48 = arith.constant 48 : index
    %c0_43 = arith.constant 0 : index
    %132 = vector.load %arg5[%c48, %c0_43] : memref<64x256xf32, #tpu.memory_space<vmem>>, vector<8x256xf32>
    %cst_44 = arith.constant dense<0.000000e+00> : vector<8x256xf32>
    %133 = tpu.matmul %130, %9, %cst_44 {dimension_numbers = #tpu.dot_dimension_numbers<[1], [0], [0], [1], [0, 0, 1, 1], [], []>} : vector<8x64xf32>, vector<64x256xf32>, vector<8x256xf32> -> vector<8x256xf32>
    %134 = arith.addf %132, %133 : vector<8x256xf32>
    %135 = vector.extract_strided_slice %134 {offsets = [0, 0], sizes = [8, 192], strides = [1, 1]} : vector<8x256xf32> to vector<8x192xf32>
    %136 = arith.negf %135 : vector<8x192xf32>
    %137 = math.exp %136 : vector<8x192xf32>
    %cst_45 = arith.constant 1.000000e+00 : f32
    %138 = vector.broadcast %cst_45 : f32 to vector<8x192xf32>
    %139 = arith.addf %138, %137 : vector<8x192xf32>
    %140 = arith.divf %138, %139 : vector<8x192xf32>
    %141 = vector.extract_strided_slice %134 {offsets = [0, 192], sizes = [8, 64], strides = [1, 1]} : vector<8x256xf32> to vector<8x64xf32>
    %142 = math.tanh %141 : vector<8x64xf32>
    %143 = vector.extract_strided_slice %140 {offsets = [0, 0], sizes = [8, 64], strides = [1, 1]} : vector<8x192xf32> to vector<8x64xf32>
    %144 = vector.extract_strided_slice %140 {offsets = [0, 64], sizes = [8, 64], strides = [1, 1]} : vector<8x192xf32> to vector<8x64xf32>
    %145 = vector.extract_strided_slice %140 {offsets = [0, 128], sizes = [8, 64], strides = [1, 1]} : vector<8x192xf32> to vector<8x64xf32>
    %146 = arith.mulf %144, %128 : vector<8x64xf32>
    %147 = arith.mulf %143, %142 : vector<8x64xf32>
    %148 = arith.addf %146, %147 : vector<8x64xf32>
    %149 = math.tanh %148 : vector<8x64xf32>
    %150 = arith.mulf %145, %149 : vector<8x64xf32>
    %c48_46 = arith.constant 48 : index
    %c0_47 = arith.constant 0 : index
    %151 = vector.load %arg6[%c48_46, %c0_47] : memref<64x64xf32, #tpu.memory_space<vmem>>, vector<8x64xf32>
    tpu.vector_store %arg6[%c48_46, %c0_47], %150 {strides = array<i32>} : memref<64x64xf32, #tpu.memory_space<vmem>>, vector<8x64xf32>,
    %c56 = arith.constant 56 : index
    %c0_48 = arith.constant 0 : index
    %152 = vector.load %arg5[%c56, %c0_48] : memref<64x256xf32, #tpu.memory_space<vmem>>, vector<8x256xf32>
    %cst_49 = arith.constant dense<0.000000e+00> : vector<8x256xf32>
    %153 = tpu.matmul %150, %9, %cst_49 {dimension_numbers = #tpu.dot_dimension_numbers<[1], [0], [0], [1], [0, 0, 1, 1], [], []>} : vector<8x64xf32>, vector<64x256xf32>, vector<8x256xf32> -> vector<8x256xf32>
    %154 = arith.addf %152, %153 : vector<8x256xf32>
    %155 = vector.extract_strided_slice %154 {offsets = [0, 0], sizes = [8, 192], strides = [1, 1]} : vector<8x256xf32> to vector<8x192xf32>
    %156 = arith.negf %155 : vector<8x192xf32>
    %157 = math.exp %156 : vector<8x192xf32>
    %cst_50 = arith.constant 1.000000e+00 : f32
    %158 = vector.broadcast %cst_50 : f32 to vector<8x192xf32>
    %159 = arith.addf %158, %157 : vector<8x192xf32>
    %160 = arith.divf %158, %159 : vector<8x192xf32>
    %161 = vector.extract_strided_slice %154 {offsets = [0, 192], sizes = [8, 64], strides = [1, 1]} : vector<8x256xf32> to vector<8x64xf32>
    %162 = math.tanh %161 : vector<8x64xf32>
    %163 = vector.extract_strided_slice %160 {offsets = [0, 0], sizes = [8, 64], strides = [1, 1]} : vector<8x192xf32> to vector<8x64xf32>
    %164 = vector.extract_strided_slice %160 {offsets = [0, 64], sizes = [8, 64], strides = [1, 1]} : vector<8x192xf32> to vector<8x64xf32>
    %165 = vector.extract_strided_slice %160 {offsets = [0, 128], sizes = [8, 64], strides = [1, 1]} : vector<8x192xf32> to vector<8x64xf32>
    %166 = arith.mulf %164, %148 : vector<8x64xf32>
    %167 = arith.mulf %163, %162 : vector<8x64xf32>
    %168 = arith.addf %166, %167 : vector<8x64xf32>
    %169 = math.tanh %168 : vector<8x64xf32>
    %170 = arith.mulf %165, %169 : vector<8x64xf32>
    %c56_51 = arith.constant 56 : index
    %c0_52 = arith.constant 0 : index
    %171 = vector.load %arg6[%c56_51, %c0_52] : memref<64x64xf32, #tpu.memory_space<vmem>>, vector<8x64xf32>
    tpu.vector_store %arg6[%c56_51, %c0_52], %170 {strides = array<i32>} : memref<64x64xf32, #tpu.memory_space<vmem>>, vector<8x64xf32>,
    %c80 = arith.constant 80 : index
    %c0_53 = arith.constant 0 : index
    %172 = vector.load %arg2[%c80, %c0_53] : memref<144x256xf32, #tpu.memory_space<vmem>>, vector<64x256xf32>
    %c0_54 = arith.constant 0 : index
    %c0_55 = arith.constant 0 : index
    %173 = vector.load %arg6[%c0_54, %c0_55] : memref<64x64xf32, #tpu.memory_space<vmem>>, vector<64x64xf32>
    %174 = vector.extract_strided_slice %172 {offsets = [0, 0], sizes = [64, 64], strides = [1, 1]} : vector<64x256xf32> to vector<64x64xf32>
    %cst_56 = arith.constant dense<0.000000e+00> : vector<8x64xf32>
    %175 = tpu.matmul %170, %174, %cst_56 {dimension_numbers = #tpu.dot_dimension_numbers<[1], [0], [0], [1], [0, 0, 1, 1], [], []>} : vector<8x64xf32>, vector<64x64xf32>, vector<8x64xf32> -> vector<8x64xf32>
    %176 = vector.extract_strided_slice %0 {offsets = [1, 0], sizes = [1, 64], strides = [1, 1]} : vector<8x256xf32> to vector<1x64xf32>
    %177 = vector.broadcast %176 : vector<1x64xf32> to vector<8x64xf32>
    %178 = arith.addf %175, %177 : vector<8x64xf32>
    %179 = vector.extract_strided_slice %172 {offsets = [0, 64], sizes = [64, 128], strides = [1, 1]} : vector<64x256xf32> to vector<64x128xf32>
    %cst_57 = arith.constant dense<0.000000e+00> : vector<64x128xf32>
    %180 = tpu.matmul %173, %179, %cst_57 {dimension_numbers = #tpu.dot_dimension_numbers<[1], [0], [0], [1], [0, 0, 1, 1], [], []>} : vector<64x64xf32>, vector<64x128xf32>, vector<64x128xf32> -> vector<64x128xf32>
    %181 = vector.extract_strided_slice %0 {offsets = [1, 64], sizes = [1, 128], strides = [1, 1]} : vector<8x256xf32> to vector<1x128xf32>
    %182 = vector.broadcast %181 : vector<1x128xf32> to vector<64x128xf32>
    %183 = arith.addf %180, %182 : vector<64x128xf32>
    %184 = vector.extract_strided_slice %183 {offsets = [0, 0], sizes = [64, 64], strides = [1, 1]} : vector<64x128xf32> to vector<64x64xf32>
    %185 = vector.extract_strided_slice %183 {offsets = [0, 64], sizes = [64, 64], strides = [1, 1]} : vector<64x128xf32> to vector<64x64xf32>
    %186 = vector.shape_cast %178 : vector<8x64xf32> to vector<1x8x64xf32>
    %187 = vector.shape_cast %186 : vector<1x8x64xf32> to vector<1x8x64xf32>
    %188 = vector.broadcast %187 : vector<1x8x64xf32> to vector<8x8x64xf32>
    %189 = vector.shape_cast %188 : vector<8x8x64xf32> to vector<64x64xf32>
    %190 = tpu.iota {dimensions = array<i32: 0>} : vector<64x4xi32>
    %191 = tpu.iota {dimensions = array<i32: 1>} : vector<64x4xi32>
    %c16_i32 = arith.constant 16 : i32
    %192 = vector.broadcast %c16_i32 : i32 to vector<64x4xi32>
    %193 = arith.muli %191, %192 : vector<64x4xi32>
    %194 = arith.cmpi sge, %190, %193 : vector<64x4xi32>
    %c1_i32 = arith.constant 1 : i32
    %195 = vector.broadcast %c1_i32 : i32 to vector<64x4xi32>
    %196 = arith.addi %191, %195 : vector<64x4xi32>
    %c16_i32_58 = arith.constant 16 : i32
    %197 = vector.broadcast %c16_i32_58 : i32 to vector<64x4xi32>
    %198 = arith.muli %196, %197 : vector<64x4xi32>
    %199 = arith.cmpi slt, %190, %198 : vector<64x4xi32>
    %200 = arith.andi %194, %199 : vector<64x4xi1>
    %201 = arith.extui %200 : vector<64x4xi1> to vector<64x4xi32>
    %202 = arith.sitofp %201 : vector<64x4xi32> to vector<64x4xf32>
    %203 = arith.mulf %189, %184 : vector<64x64xf32>
    %cst_59 = arith.constant dense<0.000000e+00> : vector<64x4xf32>
    %204 = tpu.matmul %203, %202, %cst_59 {dimension_numbers = #tpu.dot_dimension_numbers<[1], [0], [0], [1], [0, 0, 1, 1], [], []>} : vector<64x64xf32>, vector<64x4xf32>, vector<64x4xf32> -> vector<64x4xf32>
    %205 = vector.shape_cast %204 : vector<64x4xf32> to vector<8x8x4xf32>
    %cst_60 = arith.constant dense<0xFF800000> : vector<8x4xf32>
    %206 = vector.multi_reduction <maximumf>, %205, %cst_60 [0] : vector<8x8x4xf32> to vector<8x4xf32>
    %207 = vector.shape_cast %206 : vector<8x4xf32> to vector<1x8x4xf32>
    %208 = vector.broadcast %207 : vector<1x8x4xf32> to vector<8x8x4xf32>
    %209 = arith.subf %205, %208 : vector<8x8x4xf32>
    %210 = math.exp %209 : vector<8x8x4xf32>
    %cst_61 = arith.constant dense<0.000000e+00> : vector<8x4xf32>
    %211 = vector.multi_reduction <add>, %210, %cst_61 [0] : vector<8x8x4xf32> to vector<8x4xf32>
    %212 = vector.shape_cast %211 : vector<8x4xf32> to vector<1x8x4xf32>
    %213 = tpu.reciprocal %212 {approx = true} : vector<1x8x4xf32> -> vector<1x8x4xf32>
    %214 = vector.broadcast %213 : vector<1x8x4xf32> to vector<8x8x4xf32>
    %215 = arith.mulf %210, %214 : vector<8x8x4xf32>
    %216 = tpu.iota {dimensions = array<i32: 0>} : vector<4x64xi32>
    %217 = tpu.iota {dimensions = array<i32: 1>} : vector<4x64xi32>
    %c16_i32_62 = arith.constant 16 : i32
    %218 = vector.broadcast %c16_i32_62 : i32 to vector<4x64xi32>
    %219 = arith.muli %216, %218 : vector<4x64xi32>
    %220 = arith.cmpi sge, %217, %219 : vector<4x64xi32>
    %c1_i32_63 = arith.constant 1 : i32
    %221 = vector.broadcast %c1_i32_63 : i32 to vector<4x64xi32>
    %222 = arith.addi %216, %221 : vector<4x64xi32>
    %c16_i32_64 = arith.constant 16 : i32
    %223 = vector.broadcast %c16_i32_64 : i32 to vector<4x64xi32>
    %224 = arith.muli %222, %223 : vector<4x64xi32>
    %225 = arith.cmpi slt, %217, %224 : vector<4x64xi32>
    %226 = arith.andi %220, %225 : vector<4x64xi1>
    %227 = arith.extui %226 : vector<4x64xi1> to vector<4x64xi32>
    %228 = arith.sitofp %227 : vector<4x64xi32> to vector<4x64xf32>
    %229 = vector.shape_cast %215 : vector<8x8x4xf32> to vector<64x4xf32>
    %cst_65 = arith.constant dense<0.000000e+00> : vector<64x64xf32>
    %230 = tpu.matmul %229, %228, %cst_65 {dimension_numbers = #tpu.dot_dimension_numbers<[1], [0], [0], [1], [0, 0, 1, 1], [], []>} : vector<64x4xf32>, vector<4x64xf32>, vector<64x64xf32> -> vector<64x64xf32>
    %231 = arith.mulf %230, %185 : vector<64x64xf32>
    %232 = vector.shape_cast %231 : vector<64x64xf32> to vector<8x8x64xf32>
    %cst_66 = arith.constant dense<0.000000e+00> : vector<8x64xf32>
    %233 = vector.multi_reduction <add>, %232, %cst_66 [0] : vector<8x8x64xf32> to vector<8x64xf32>
    %234 = vector.extract_strided_slice %172 {offsets = [0, 192], sizes = [64, 64], strides = [1, 1]} : vector<64x256xf32> to vector<64x64xf32>
    %cst_67 = arith.constant dense<0.000000e+00> : vector<8x64xf32>
    %235 = tpu.matmul %233, %234, %cst_67 {dimension_numbers = #tpu.dot_dimension_numbers<[1], [0], [0], [1], [0, 0, 1, 1], [], []>} : vector<8x64xf32>, vector<64x64xf32>, vector<8x64xf32> -> vector<8x64xf32>
    %236 = vector.extract_strided_slice %0 {offsets = [1, 192], sizes = [1, 64], strides = [1, 1]} : vector<8x256xf32> to vector<1x64xf32>
    %237 = vector.broadcast %236 : vector<1x64xf32> to vector<8x64xf32>
    %238 = arith.addf %235, %237 : vector<8x64xf32>
    %239 = vector.extract_strided_slice %0 {offsets = [2, 0], sizes = [1, 64], strides = [1, 1]} : vector<8x256xf32> to vector<1x64xf32>
    %cst_68 = arith.constant dense<0.000000e+00> : vector<1x8xf32>
    %240 = tpu.matmul %239, %238, %cst_68 {dimension_numbers = #tpu.dot_dimension_numbers<[1], [1], [0], [0], [0, 0, 1, 0], [], []>} : vector<1x64xf32>, vector<8x64xf32>, vector<1x8xf32> -> vector<1x8xf32>
    %241 = vector.extract_strided_slice %0 {offsets = [3, 0], sizes = [1, 1], strides = [1, 1]} : vector<8x256xf32> to vector<1x1xf32>
    %242 = vector.broadcast %241 : vector<1x1xf32> to vector<1x8xf32>
    %243 = arith.addf %240, %242 : vector<1x8xf32>
    %c0_69 = arith.constant 0 : index
    %c0_70 = arith.constant 0 : index
    %c0_71 = arith.constant 0 : index
    %244 = vector.load %arg4[%c0_69, %c0_70, %c0_71] : memref<1x1x8xf32, #tpu.memory_space<vmem>>, vector<1x1x8xf32>
    %245 = vector.shape_cast %244 : vector<1x1x8xf32> to vector<1x8xf32>
    %246 = vector.shape_cast %243 : vector<1x8xf32> to vector<1x1x8xf32>
    tpu.vector_store %arg4[%c0_69, %c0_70, %c0_71], %246 {strides = array<i32>} : memref<1x1x8xf32, #tpu.memory_space<vmem>>, vector<1x1x8xf32>,
    return
  }
  func.func @transform_0(%arg0: i32) -> (i32, i32, i32) {
    %c0_i32 = arith.constant 0 : i32
    %c0_i32_0 = arith.constant 0 : i32
    %c0_i32_1 = arith.constant 0 : i32
    return %arg0, %c0_i32, %c0_i32_0 : i32, i32, i32
  }
  func.func @transform_1(%arg0: i32) -> (i32, i32) {
    %c0_i32 = arith.constant 0 : i32
    %c0_i32_0 = arith.constant 0 : i32
    %c0_i32_1 = arith.constant 0 : i32
    return %c0_i32, %c0_i32_0 : i32, i32
  }
  func.func @transform_2(%arg0: i32) -> (i32, i32) {
    %c0_i32 = arith.constant 0 : i32
    %c0_i32_0 = arith.constant 0 : i32
    %c0_i32_1 = arith.constant 0 : i32
    return %c0_i32, %c0_i32_0 : i32, i32
  }
  func.func @transform_3(%arg0: i32) -> (i32, i32, i32) {
    %c0_i32 = arith.constant 0 : i32
    %c0_i32_0 = arith.constant 0 : i32
    %c0_i32_1 = arith.constant 0 : i32
    return %arg0, %c0_i32, %c0_i32_0 : i32, i32, i32
  }
}

</mosaic_0001>

<bundles_post_ra>
// kernel: tpu_custom_call.1
= control target key start
LH: loop header
LB: loop body
LE: loop exit
PB: predicated region body
PF: predicated region fallthrough
CT: control target
= control target key end

     0   :  { %8 = vsyncpa [#allocation5], 0  ;;  %s3181_s0 = inlined_call_operand.vmem [shape: f32[1,64,8], index: 0, kind: input, shape index: {}]   ;;  %s3182_s1 = inlined_call_operand.hbm [shape: f32[144,256], index: 1, kind: input, shape index: {}]   ;;  %s3183_s2 = inlined_call_operand.vmem [shape: f32[8,256], index: 2, kind: input, shape index: {}]   ;;  %s3184_s3 = inlined_call_operand.hbm [shape: f32[1,1,8], index: 3, kind: output, shape index: {}]  }
   0x1   :  { %9 = vsyncpa [#allocation6], 0  ;;  %s2713_s12 = smov [#allocation4]   ;;  %s2665_s16 = scalar_lea.hbm %s3182_s1, 4608 }
   0x2   :  { %s17_s13 = sshll.u32 %s2713_s12, 4  ;;  %p2666_p0 = scmp.ne.s32.totalorder %s3182_s1, %s2665_s16  ;;  %s18_s13 = int_to_ptr.vmem [resolvable:$true] %s17_s13 }
   0x3   :  { %p2669_p1 = scmp.lt.u32.totalorder %s2665_s16, %s3182_s1 }
   0x5   :  { %p2671_p2 = pnand %p2669_p1, %p2666_p0 }
   0x7   :  { %2674 = shalt.err (!%p2671_p2)
}
   0x8   :  { %s2675_s21 = scalar_lea.vmem %s18_s13, 4608  ;;  %p2680_p4 = scmp.lt.s32.totalorder %s18_s13, %s18_s13 }
   0x9   :  { %p2676_p3 = scmp.ne.s32.totalorder %s18_s13, %s2675_s21  ;;  %p2681_p5 = scmp.lt.s32.totalorder %s2675_s21, %s2675_s21 }
   0xb   :  { %p2682_p6 = por %p2681_p5, %p2680_p4 }
   0xd   :  { %p2683_p7 = pnand %p2682_p6, %p2676_p3 }
   0xf   :  { %2686 = shalt.err (!%p2683_p7)
}
  0x10   :  { %s2714_s22 = smov 256   ;;  %s2715_s23 = smov 16  }
  0x11   :  { %23 = dma.hbm_to_vmem [thread:$0]  %s3182_s1, 4608, %s18_s13, [#allocation5], %s2714_s22, %s2714_s22, %s2715_s23  }
  0x12   :  { %2709 = dma.done.wait [#allocation5], 4608  }
  0x13   :  { %2710 = vsyncadd [#allocation5], 4294962688  ;;  %v2716_v0 = vmov 0.0   ;;  %v40_v1 = vld [vmem:[#allocation4 + $0x8] sm:$0xff]  ;;  %v39_v2 = vld [vmem:[#allocation4] sm:$0xff]  ;;  %vm49_vm0 = vcmask 64512   ;;  %v41_v32 = vlaneseq }
  0x14   :  { %162 = vmatprep.mubr.f32.mxu1 %v2716_v0  ;;  %138 = vmatprep.mubr.f32.mxu0 %v2716_v0  ;;  %v35_v3 = vld [vmem:[%s3181_s0 + $0x20] sm:$0xff]  ;;  %v204_v4 = vld [vmem:[#allocation4 + $0x28] sm:$0xff]  ;;  %v206_v5 = vld [vmem:[#allocation4 + $0x38] sm:$0xff]  ;;  %s2717_s12 = smov 64   ;;  %vm3187_vm1 = vcmask 523264   ;;  %vm3185_vm2 = vmmov 0  }
  0x15   :  { %2465 = vmatprep.subr.mxu1 %v40_v1  ;;  %v203_v6 = vld [vmem:[#allocation4 + $0x20] sm:$0xff]  ;;  %74 = vmatprep.subr.mxu0 %v40_v1  ;;  %v2760_v7 = vpack.c.bf16 %v206_v5, %v204_v4  ;;  %v205_v8 = vld [vmem:[#allocation4 + $0x30] sm:$0xff]  ;;  %v208_v9 = vld [vmem:[#allocation4 + $0x48] sm:$0xff]  ;;  %v2821_v35 = vshrl.u32 %v41_v32, 7  ;;  %s2722_s20 = smov [#allocation7]  }
  0x16   :  { %2466 = vmatpush1.msra.mxu1 %v39_v2  ;;  %75 = vmatpush1.msra.mxu0 %v39_v2  ;;  %v2763_v10 = vpack.c.bf16 %v205_v8, %v203_v6  ;;  %v210_v11 = vld [vmem:[#allocation4 + $0x58] sm:$0xff]  ;;  %v207_v12 = vld [vmem:[#allocation4 + $0x40] sm:$0xff]  ;;  %v209_v13 = vld [vmem:[#allocation4 + $0x50] sm:$0xff]  ;;  %s2021_s21 = sshll.u32 %s2722_s20, 4  ;;  %s2022_s21 = int_to_ptr.vmem [resolvable:$true] %s2021_s21 }
  0x17   :  { %2034 = vmatmul.mubr.msk.f32.vlgmr.msra.gmra.mrb[0].mxu1 %vm49_vm0, %v35_v3  ;;  %2282 = vmatprep.subr.bf16.mxu1 %v2760_v7  ;;  %v36_v14 = vld [vmem:[%s3181_s0 + $0x28] sm:$0xff]  ;;  %v2770_v15 = vpack.c.bf16 %v210_v11, %v208_v9  ;;  %v212_v16 = vld [vmem:[#allocation4 + $0x68] sm:$0xff]  ;;  %v2773_v18 = vpack.c.bf16 %v209_v13, %v207_v12  ;;  %v211_v20 = vld [vmem:[#allocation4 + $0x60] sm:$0xff]  ;;  %v43_v40 = vsub.s32 0, %v2821_v35  ;;  %s2691_s22 = scalar_lea.vmem %s2022_s21, 32  ;;  %p2692_p9 = scmp.lt.s32.totalorder %s2022_s21, %s2022_s21 }
  0x18   :  { %168 = vmatprep.mubr.f32.mxu1 %v2716_v0  ;;  %v214_v17 = vld [vmem:[#allocation4 + $0x78] sm:$0xff]  ;;  %2284 = vmatpush1.bf16.msra.mxu1 %v2763_v10  ;;  %v213_v21 = vld [vmem:[#allocation4 + $0x70] sm:$0xff]  ;;  %v216_v23 = vld [vmem:[#allocation4 + $0x88] sm:$0xff] }
  0x19   :  { %2298 = vmatprep.subr.bf16.mxu0 %v2760_v7  ;;  %2286 = vmatprep.subr.bf16.mxu1 %v2770_v15  ;;  %v2777_v19 = vpack.c.bf16 %v214_v17, %v212_v16  ;;  %v31_v22 = vld [vmem:[%s3181_s0] sm:$0xff]  ;;  %v218_v24 = vld [vmem:[#allocation4 + $0x98] sm:$0xff]  ;;  %v37_v25 = vld [vmem:[%s3181_s0 + $0x30] sm:$0xff]  ;;  %v2790_v26 = vpack.c.bf16 %v213_v21, %v211_v20 }
  0x1a   :  { %2030 = vmatmul.mubr.msk.f32.vlgmr.msra.gmra.mrb[0].mxu0 %vm49_vm0, %v31_v22  ;;  %v2794_v27 = vpack.c.bf16 %v218_v24, %v216_v23  ;;  %v215_v28 = vld [vmem:[#allocation4 + $0x80] sm:$0xff]  ;;  %v217_v29 = vld [vmem:[#allocation4 + $0x90] sm:$0xff]  ;;  %v38_v30 = vld [vmem:[%s3181_s0 + $0x38] sm:$0xff] }
  0x1b   :  { %2035 = vmatmul.mubr.msk.f32.gmra.mrb[2].mxu1 %vm49_vm0, %v36_v14  ;;  %2300 = vmatpush1.bf16.msra.mxu0 %v2763_v10  ;;  %v2804_v31 = vpack.c.bf16 %v217_v29, %v215_v28  ;;  %v2833_v42 = vld [vmem:[%s3183_s2] sm:$0xff]  ;;  %v2840_v44 = vld [vmem:[%s3183_s2 + $0x8] sm:$0xff]  ;;  %v33_v63 = vld [vmem:[%s3181_s0 + $0x10] sm:$0xff] }
  0x1c   :  { %174 = vmatprep.mubr.f32.mxu1 %v2716_v0  ;;  %2288 = vmatpush1.bf16.msra.mxu1 %v2773_v18  ;;  %v2843_v45 = vrot.slane %v2833_v42, %v43_v40  ;;  %v2848_v47 = vrot.slane %v2840_v44, %v43_v40  ;;  %v32_v62 = vld [vmem:[%s3181_s0 + $0x8] sm:$0xff]  ;;  %v34_v1 = vld [vmem:[%s3181_s0 + $0x18] sm:$0xff] }
  0x1d   :  { %144 = vmatprep.mubr.f32.mxu0 %v2716_v0  ;;  %2290 = vmatprep.subr.bf16.mxu1 %v2777_v19 }
  0x1e   :  { %2302 = vmatprep.subr.bf16.mxu0 %v2770_v15  ;;  %2031 = vmatmul.mubr.msk.f32.gmra.mrb[2].mxu0 %vm49_vm0, %v32_v62 }
  0x1f   :  { %2036 = vmatmul.mubr.msk.f32.gmra.mrb[4].mxu1 %vm49_vm0, %v37_v25  ;;  %2304 = vmatpush1.bf16.msra.mxu0 %v2773_v18 }
  0x20   :  { %180 = vmatprep.mubr.f32.mxu1 %v2716_v0  ;;  %2292 = vmatpush1.bf16.msra.mxu1 %v2790_v26 }
  0x21   :  { %2306 = vmatprep.subr.bf16.mxu0 %v2777_v19  ;;  %2294 = vmatprep.subr.bf16.mxu1 %v2794_v27 }
  0x22   :  { %150 = vmatprep.mubr.f32.mxu0 %v2716_v0 }
  0x23   :  { %2037 = vmatmul.mubr.msk.f32.gmra.mrb[6].mxu1 %vm49_vm0, %v38_v30  ;;  %2308 = vmatpush1.bf16.msra.mxu0 %v2790_v26 }
  0x24   :  { %289 = vmatprep.mubr.f32.mxu1 %v2716_v0  ;;  %2296 = vmatpush1.bf16.msra.mxu1 %v2804_v31 }
  0x25   :  { %2310 = vmatprep.subr.bf16.mxu0 %v2794_v27  ;;  %2032 = vmatmul.mubr.msk.f32.gmra.mrb[4].mxu0 %vm49_vm0, %v33_v63 }
  0x26   :  { %156 = vmatprep.mubr.f32.mxu0 %v2716_v0 }
  0x27   :  { %290 = vmatmul.mubr.f32.vlgmr.msra.gmra.mrb[8].mxu1 %v2716_v0  ;;  %2312 = vmatpush1.bf16.msra.mxu0 %v2804_v31 }
  0x28   :  { %2314 = vmatprep.subr.bf16.mxu0 %v2760_v7  ;;  %2184 = vmatprep.mubr.msk.f32.mxu1 %vm3185_vm2, %v2716_v0 }
  0x29   :  { %2033 = vmatmul.mubr.msk.f32.gmra.mrb[6].mxu0 %vm49_vm0, %v34_v1 }
  0x2a   :  { %398 = vmatprep.mubr.f32.mxu0 %v2716_v0 }
  0xea   :  { %v2816_v33 = vpop.f32.mrb[0].mxu1 }
  0xeb   :  { %v2818_v34 = vpop.f32.mrb[1].mxu1 }
  0xed   :  { %v140_v37 = vpop.f32.mrb[0].mxu0 }
  0xee   :  { %v2823_v36 = vpop.f32.mrb[2].mxu1  ;;  %v142_v39 = vpop.f32.mrb[1].mxu0  ;;  %v141_v49 = vadd.f32 %v140_v37, %v2843_v45 }
  0xef   :  { %v2825_v38 = vpop.f32.mrb[3].mxu1  ;;  %v143_v50 = vadd.f32 %v142_v39, %v2848_v47 }
  0xf2   :  { %v2828_v41 = vpop.f32.mrb[4].mxu1 }
  0xf3   :  { %v2835_v43 = vpop.f32.mrb[5].mxu1 }
  0xf6   :  { %v2845_v46 = vpop.f32.mrb[6].mxu1 }
  0xf7   :  { %v2850_v48 = vpop.f32.mrb[7].mxu1 }
  0xfa   :  { %v291_v51 = vpop.f32.mrb[8].mxu1 }
  0xfb   :  { %v296_v52 = vadd.f32 %v291_v51, %v141_v49  ;;  %v293_v53 = vpop.f32.mrb[9].mxu1 }
  0xfc   :  { %v297_v54 = vadd.f32 %v293_v53, %v143_v50 }
  0xfd   :  { %v2038_v56 = vmul.f32 -1.442695, %v296_v52 }
  0xfe   :  { %2550 = vtanh.f32 %v297_v54  ;;  %v2039_v6 = vmul.f32 -1.442695, %v297_v54 }
  0xff   :  { %2552 = vpow2.f32 %v2038_v56 }
 0x108   :  { %v2551_v55 = vpop.eup %2550 }
 0x109   :  { %313 = vrot.lane.b32.xlu0 %v2551_v55, %s2717_s12  ;;  %v2553_v57 = vpop.eup %2552 }
 0x10a   :  { %v304_v58 = vadd.f32 1.0, %v2553_v57 }
 0x10c   :  { %2554 = vrcp.f32 %v304_v58 }
 0x116   :  { %v2555_v59 = vpop.eup %2554 }
 0x117   :  { %v311_v2 = vmul.f32 0.0, %v2555_v59 }
 0x17b   :  { %v314_v60 = vpop.permute.xlu0 %313 }
 0x17c   :  { %v316_v61 = vmul.f32 %v2555_v59, %v314_v60 }
 0x17e   :  { %318 = vrot.lane.b32.xlu0 %v316_v61, %s2717_s12 }
 0x1f0   :  { %v319_v3 = vpop.permute.xlu0 %318 }
 0x1f1   :  { %v321_v4 = vadd.f32 %v319_v3, %v311_v2 }
 0x1f3   :  { %2556 = vtanh.f32 %v321_v4 }
 0x1f4   :  { %2558 = vpow2.f32 %v2039_v6 }
 0x1fd   :  { %v2557_v5 = vpop.eup %2556 }
 0x1fe   :  { %324 = vrot.lane.b32.xlu1 %v2557_v5, %s2717_s12  ;;  %v2559_v8 = vpop.eup %2558 }
 0x1ff   :  { %v305_v9 = vadd.f32 1.0, %v2559_v8 }
 0x201   :  { %2560 = vrcp.f32 %v305_v9 }
 0x20b   :  { %v2561_v11 = vpop.eup %2560 }
 0x270   :  { %v325_v12 = vpop.permute.xlu1 %324 }
 0x271   :  { %v327_v13 = vmul.f32 %v2561_v11, %v325_v12 }
 0x273   :  { %328 = vst.msk [vmem:[#allocation3] sm:$0xff] %vm3187_vm1, %v327_v13  ;;  %2040 = vmatmul.mubr.msk.f32.vlgmr.msra.gmra.mrb[2].mxu0 %vm3187_vm1, %v327_v13 }
 0x274   :  { %2316 = vmatpush1.bf16.msra.mxu0 %v2763_v10  ;;  %507 = vmatprep.mubr.f32.mxu0 %v2716_v0 }
 0x275   :  { %2318 = vmatprep.subr.bf16.mxu0 %v2770_v15 }
 0x278   :  { %2320 = vmatpush1.bf16.msra.mxu0 %v2773_v18 }
 0x279   :  { %2322 = vmatprep.subr.bf16.mxu0 %v2777_v19 }
 0x27c   :  { %2324 = vmatpush1.bf16.msra.mxu0 %v2790_v26 }
 0x27d   :  { %2326 = vmatprep.subr.bf16.mxu0 %v2794_v27 }
 0x280   :  { %2328 = vmatpush1.bf16.msra.mxu0 %v2804_v31 }
 0x281   :  { %2330 = vmatprep.subr.bf16.mxu0 %v2760_v7 }
 0x346   :  { %v400_v14 = vpop.f32.mrb[2].mxu0 }
 0x347   :  { %v402_v16 = vpop.f32.mrb[3].mxu0  ;;  %v2471_v21 = vadd.f32 %v400_v14, %v2843_v45 }
 0x348   :  { %v2472_v17 = vadd.f32 %v402_v16, %v2848_v47 }
 0x349   :  { %v2041_v22 = vmul.f32 -1.442695, %v2471_v21 }
 0x34a   :  { %2562 = vtanh.f32 %v2472_v17  ;;  %v2042_v49 = vmul.f32 -1.442695, %v2472_v17 }
 0x34b   :  { %2564 = vpow2.f32 %v2041_v22 }
 0x354   :  { %v2563_v20 = vpop.eup %2562 }
 0x355   :  { %422 = vrot.lane.b32.xlu1 %v2563_v20, %s2717_s12  ;;  %v2565_v23 = vpop.eup %2564 }
 0x356   :  { %v413_v24 = vadd.f32 1.0, %v2565_v23 }
 0x358   :  { %2566 = vrcp.f32 %v413_v24 }
 0x362   :  { %v2567_v25 = vpop.eup %2566 }
 0x363   :  { %v420_v30 = vmul.f32 %v2567_v25, %v321_v4 }
 0x3c7   :  { %v423_v28 = vpop.permute.xlu1 %422 }
 0x3c8   :  { %v425_v29 = vmul.f32 %v2567_v25, %v423_v28 }
 0x3ca   :  { %427 = vrot.lane.b32.xlu0 %v425_v29, %s2717_s12 }
 0x43c   :  { %v428_v37 = vpop.permute.xlu0 %427 }
 0x43d   :  { %v430_v39 = vadd.f32 %v428_v37, %v420_v30 }
 0x43f   :  { %2568 = vtanh.f32 %v430_v39 }
 0x440   :  { %2570 = vpow2.f32 %v2042_v49 }
 0x449   :  { %v2569_v40 = vpop.eup %2568 }
 0x44a   :  { %433 = vrot.lane.b32.xlu1 %v2569_v40, %s2717_s12  ;;  %v2571_v50 = vpop.eup %2570 }
 0x44b   :  { %v414_v51 = vadd.f32 1.0, %v2571_v50 }
 0x44d   :  { %2572 = vrcp.f32 %v414_v51 }
 0x457   :  { %v2573_v52 = vpop.eup %2572 }
 0x4bc   :  { %v434_v53 = vpop.permute.xlu1 %433 }
 0x4bd   :  { %v436_v54 = vmul.f32 %v2573_v52, %v434_v53 }
 0x4bf   :  { %437 = vst.msk [vmem:[#allocation3 + $0x8] sm:$0xff] %vm3187_vm1, %v436_v54  ;;  %2043 = vmatmul.mubr.msk.f32.vlgmr.msra.gmra.mrb[4].mxu0 %vm3187_vm1, %v436_v54 }
 0x4c0   :  { %2332 = vmatpush1.bf16.msra.mxu0 %v2763_v10  ;;  %616 = vmatprep.mubr.f32.mxu0 %v2716_v0 }
 0x4c1   :  { %2334 = vmatprep.subr.bf16.mxu0 %v2770_v15 }
 0x4c4   :  { %2336 = vmatpush1.bf16.msra.mxu0 %v2773_v18 }
 0x4c5   :  { %2338 = vmatprep.subr.bf16.mxu0 %v2777_v19 }
 0x4c8   :  { %2340 = vmatpush1.bf16.msra.mxu0 %v2790_v26 }
 0x4c9   :  { %2342 = vmatprep.subr.bf16.mxu0 %v2794_v27 }
 0x4cc   :  { %2344 = vmatpush1.bf16.msra.mxu0 %v2804_v31 }
 0x4cd   :  { %2346 = vmatprep.subr.bf16.mxu0 %v2760_v7 }
 0x592   :  { %v509_v55 = vpop.f32.mrb[4].mxu0 }
 0x593   :  { %v511_v56 = vpop.f32.mrb[5].mxu0  ;;  %v2473_v59 = vadd.f32 %v509_v55, %v2843_v45 }
 0x594   :  { %v2474_v57 = vadd.f32 %v511_v56, %v2848_v47  ;;  %v165_v56 = vadd.f32 %v2816_v33, %v2843_v45 }
 0x595   :  { %v2044_v60 = vmul.f32 -1.442695, %v2473_v59 }
 0x596   :  { %2574 = vtanh.f32 %v2474_v57  ;;  %v2045_v8 = vmul.f32 -1.442695, %v2474_v57  ;;  %v167_v57 = vadd.f32 %v2818_v34, %v2848_v47 }
 0x597   :  { %2576 = vpow2.f32 %v2044_v60 }
 0x5a0   :  { %v2575_v58 = vpop.eup %2574 }
 0x5a1   :  { %531 = vrot.lane.b32.xlu0 %v2575_v58, %s2717_s12  ;;  %v2577_v61 = vpop.eup %2576 }
 0x5a2   :  { %v522_v62 = vadd.f32 1.0, %v2577_v61 }
 0x5a4   :  { %2578 = vrcp.f32 %v522_v62 }
 0x5ae   :  { %v2579_v63 = vpop.eup %2578 }
 0x5af   :  { %v529_v3 = vmul.f32 %v2579_v63, %v430_v39 }
 0x613   :  { %v532_v1 = vpop.permute.xlu0 %531 }
 0x614   :  { %v534_v2 = vmul.f32 %v2579_v63, %v532_v1 }
 0x616   :  { %536 = vrot.lane.b32.xlu1 %v534_v2, %s2717_s12 }
 0x688   :  { %v537_v4 = vpop.permute.xlu1 %536 }
 0x689   :  { %v539_v5 = vadd.f32 %v537_v4, %v529_v3 }
 0x68b   :  { %2580 = vtanh.f32 %v539_v5 }
 0x68c   :  { %2582 = vpow2.f32 %v2045_v8 }
 0x695   :  { %v2581_v6 = vpop.eup %2580 }
 0x696   :  { %542 = vrot.lane.b32.xlu0 %v2581_v6, %s2717_s12  ;;  %v2583_v9 = vpop.eup %2582 }
 0x697   :  { %v523_v11 = vadd.f32 1.0, %v2583_v9 }
 0x699   :  { %2584 = vrcp.f32 %v523_v11 }
 0x6a3   :  { %v2585_v12 = vpop.eup %2584 }
 0x708   :  { %v543_v13 = vpop.permute.xlu0 %542 }
 0x709   :  { %v545_v14 = vmul.f32 %v2585_v12, %v543_v13 }
 0x70b   :  { %546 = vst.msk [vmem:[#allocation3 + $0x10] sm:$0xff] %vm3187_vm1, %v545_v14  ;;  %2046 = vmatmul.mubr.msk.f32.vlgmr.msra.gmra.mrb[6].mxu0 %vm3187_vm1, %v545_v14 }
 0x70c   :  { %2348 = vmatpush1.bf16.msra.mxu0 %v2763_v10  ;;  %725 = vmatprep.mubr.f32.mxu0 %v2716_v0 }
 0x70d   :  { %2350 = vmatprep.subr.bf16.mxu0 %v2770_v15 }
 0x710   :  { %2352 = vmatpush1.bf16.msra.mxu0 %v2773_v18 }
 0x711   :  { %2354 = vmatprep.subr.bf16.mxu0 %v2777_v19 }
 0x714   :  { %2356 = vmatpush1.bf16.msra.mxu0 %v2790_v26 }
 0x715   :  { %2358 = vmatprep.subr.bf16.mxu0 %v2794_v27 }
 0x718   :  { %2360 = vmatpush1.bf16.msra.mxu0 %v2804_v31 }
 0x719   :  { %2362 = vmatprep.subr.bf16.mxu0 %v2760_v7 }
 0x7de   :  { %v618_v16 = vpop.f32.mrb[6].mxu0 }
 0x7df   :  { %v620_v17 = vpop.f32.mrb[7].mxu0  ;;  %v2475_v22 = vadd.f32 %v618_v16, %v2843_v45 }
 0x7e0   :  { %v2476_v20 = vadd.f32 %v620_v17, %v2848_v47  ;;  %v171_v17 = vadd.f32 %v2823_v36, %v2843_v45 }
 0x7e1   :  { %v2047_v23 = vmul.f32 -1.442695, %v2475_v22 }
 0x7e2   :  { %2586 = vtanh.f32 %v2476_v20  ;;  %v2048_v50 = vmul.f32 -1.442695, %v2476_v20  ;;  %v173_v20 = vadd.f32 %v2825_v38, %v2848_v47 }
 0x7e3   :  { %2588 = vpow2.f32 %v2047_v23 }
 0x7ec   :  { %v2587_v21 = vpop.eup %2586 }
 0x7ed   :  { %640 = vrot.lane.b32.xlu1 %v2587_v21, %s2717_s12  ;;  %v2589_v24 = vpop.eup %2588 }
 0x7ee   :  { %v631_v25 = vadd.f32 1.0, %v2589_v24 }
 0x7f0   :  { %2590 = vrcp.f32 %v631_v25 }
 0x7fa   :  { %v2591_v28 = vpop.eup %2590 }
 0x7fb   :  { %v638_v37 = vmul.f32 %v2591_v28, %v539_v5 }
 0x85f   :  { %v641_v29 = vpop.permute.xlu1 %640 }
 0x860   :  { %v643_v30 = vmul.f32 %v2591_v28, %v641_v29 }
 0x862   :  { %645 = vrot.lane.b32.xlu0 %v643_v30, %s2717_s12 }
 0x8d4   :  { %v646_v39 = vpop.permute.xlu0 %645 }
 0x8d5   :  { %v648_v40 = vadd.f32 %v646_v39, %v638_v37 }
 0x8d7   :  { %2592 = vtanh.f32 %v648_v40 }
 0x8d8   :  { %2594 = vpow2.f32 %v2048_v50 }
 0x8e1   :  { %v2593_v49 = vpop.eup %2592 }
 0x8e2   :  { %651 = vrot.lane.b32.xlu1 %v2593_v49, %s2717_s12  ;;  %v2595_v51 = vpop.eup %2594 }
 0x8e3   :  { %v632_v52 = vadd.f32 1.0, %v2595_v51 }
 0x8e5   :  { %2596 = vrcp.f32 %v632_v52 }
 0x8ef   :  { %v2597_v53 = vpop.eup %2596 }
 0x954   :  { %v652_v54 = vpop.permute.xlu1 %651 }
 0x955   :  { %v654_v55 = vmul.f32 %v2597_v53, %v652_v54 }
 0x957   :  { %655 = vst.msk [vmem:[#allocation3 + $0x18] sm:$0xff] %vm3187_vm1, %v654_v55  ;;  %2049 = vmatmul.mubr.msk.f32.vlgmr.msra.gmra.mrb[8].mxu0 %vm3187_vm1, %v654_v55 }
 0x958   :  { %2364 = vmatpush1.bf16.msra.mxu0 %v2763_v10  ;;  %834 = vmatprep.mubr.f32.mxu0 %v2716_v0 }
 0x959   :  { %2366 = vmatprep.subr.bf16.mxu0 %v2770_v15 }
 0x95c   :  { %2368 = vmatpush1.bf16.msra.mxu0 %v2773_v18 }
 0x95d   :  { %2370 = vmatprep.subr.bf16.mxu0 %v2777_v19 }
 0x960   :  { %2372 = vmatpush1.bf16.msra.mxu0 %v2790_v26 }
 0x961   :  { %2374 = vmatprep.subr.bf16.mxu0 %v2794_v27 }
 0x964   :  { %2376 = vmatpush1.bf16.msra.mxu0 %v2804_v31 }
 0x965   :  { %2378 = vmatprep.subr.bf16.mxu0 %v2760_v7 }
 0xa2a   :  { %v727_v58 = vpop.f32.mrb[8].mxu0 }
 0xa2b   :  { %v732_v59 = vadd.f32 %v727_v58, %v165_v56  ;;  %v729_v60 = vpop.f32.mrb[9].mxu0  ;;  %v177_v56 = vadd.f32 %v2828_v41, %v2843_v45 }
 0xa2c   :  { %v733_v61 = vadd.f32 %v729_v60, %v167_v57 }
 0xa2d   :  { %v2050_v63 = vmul.f32 -1.442695, %v732_v59 }
 0xa2e   :  { %2598 = vtanh.f32 %v733_v61  ;;  %v2051_v9 = vmul.f32 -1.442695, %v733_v61 }
 0xa2f   :  { %2600 = vpow2.f32 %v2050_v63 }
 0xa38   :  { %v2599_v62 = vpop.eup %2598 }
 0xa39   :  { %749 = vrot.lane.b32.xlu0 %v2599_v62, %s2717_s12  ;;  %v2601_v1 = vpop.eup %2600 }
 0xa3a   :  { %v740_v2 = vadd.f32 1.0, %v2601_v1 }
 0xa3c   :  { %2602 = vrcp.f32 %v740_v2 }
 0xa46   :  { %v2603_v3 = vpop.eup %2602 }
 0xa47   :  { %v747_v33 = vmul.f32 %v2603_v3, %v648_v40 }
 0xaab   :  { %v750_v4 = vpop.permute.xlu0 %749 }
 0xaac   :  { %v752_v5 = vmul.f32 %v2603_v3, %v750_v4 }
 0xaae   :  { %754 = vrot.lane.b32.xlu1 %v752_v5, %s2717_s12 }
 0xb20   :  { %v755_v34 = vpop.permute.xlu1 %754 }
 0xb21   :  { %v757_v6 = vadd.f32 %v755_v34, %v747_v33  ;;  %v183_v34 = vadd.f32 %v2845_v46, %v2843_v45  ;;  %v1093_v45 = vld [vmem:[#allocation4 + $0xa8] sm:$0xff] }
 0xb23   :  { %2604 = vtanh.f32 %v757_v6 }
 0xb24   :  { %2606 = vpow2.f32 %v2051_v9 }
 0xb2d   :  { %v2605_v8 = vpop.eup %2604 }
 0xb2e   :  { %760 = vrot.lane.b32.xlu0 %v2605_v8, %s2717_s12  ;;  %v2607_v11 = vpop.eup %2606 }
 0xb2f   :  { %v741_v12 = vadd.f32 1.0, %v2607_v11 }
 0xb31   :  { %2608 = vrcp.f32 %v741_v12 }
 0xb3b   :  { %v2609_v13 = vpop.eup %2608 }
 0xba0   :  { %v761_v14 = vpop.permute.xlu0 %760 }
 0xba1   :  { %v763_v16 = vmul.f32 %v2609_v13, %v761_v14 }
 0xba3   :  { %764 = vst.msk [vmem:[#allocation3 + $0x20] sm:$0xff] %vm3187_vm1, %v763_v16  ;;  %2052 = vmatmul.mubr.msk.f32.vlgmr.msra.gmra.mrb[10].mxu0 %vm3187_vm1, %v763_v16 }
 0xba4   :  { %2380 = vmatpush1.bf16.msra.mxu0 %v2763_v10  ;;  %943 = vmatprep.mubr.f32.mxu0 %v2716_v0 }
 0xba5   :  { %2382 = vmatprep.subr.bf16.mxu0 %v2770_v15 }
 0xba8   :  { %2384 = vmatpush1.bf16.msra.mxu0 %v2773_v18 }
 0xba9   :  { %2386 = vmatprep.subr.bf16.mxu0 %v2777_v19 }
 0xbac   :  { %2388 = vmatpush1.bf16.msra.mxu0 %v2790_v26 }
 0xbad   :  { %2390 = vmatprep.subr.bf16.mxu0 %v2794_v27 }
 0xbb0   :  { %2392 = vmatpush1.bf16.msra.mxu0 %v2804_v31 }
 0xbb1   :  { %2394 = vmatprep.subr.bf16.mxu0 %v2760_v7 }
 0xc76   :  { %v836_v21 = vpop.f32.mrb[10].mxu0 }
 0xc77   :  { %v841_v22 = vadd.f32 %v836_v21, %v171_v17  ;;  %v838_v23 = vpop.f32.mrb[11].mxu0  ;;  %v1094_v21 = vld [vmem:[#allocation4 + $0xb0] sm:$0xff] }
 0xc78   :  { %v842_v24 = vadd.f32 %v838_v23, %v173_v20  ;;  %v1092_v20 = vld [vmem:[#allocation4 + $0xa0] sm:$0xff] }
 0xc79   :  { %v2053_v28 = vmul.f32 -1.442695, %v841_v22  ;;  %v2509_v46 = vpack.i.bf16 %v1093_v45, %v1092_v20  ;;  %v1095_v22 = vld [vmem:[#allocation4 + $0xb8] sm:$0xff] }
 0xc7a   :  { %2610 = vtanh.f32 %v842_v24  ;;  %v2054_v50 = vmul.f32 -1.442695, %v842_v24  ;;  %v2514_v24 = vpack.i.bf16 %v1095_v22, %v1094_v21 }
 0xc7b   :  { %2612 = vpow2.f32 %v2053_v28  ;;  %v1097_v28 = vld [vmem:[#allocation4 + $0xc8] sm:$0xff] }
 0xc84   :  { %v2611_v25 = vpop.eup %2610 }
 0xc85   :  { %858 = vrot.lane.b32.xlu1 %v2611_v25, %s2717_s12  ;;  %v2613_v29 = vpop.eup %2612  ;;  %v1096_v25 = vld [vmem:[#allocation4 + $0xc0] sm:$0xff] }
 0xc86   :  { %v849_v30 = vadd.f32 1.0, %v2613_v29  ;;  %v2519_v29 = vpack.i.bf16 %v1097_v28, %v1096_v25 }
 0xc88   :  { %2614 = vrcp.f32 %v849_v30  ;;  %v1100_v30 = vld [vmem:[#allocation4 + $0xe0] sm:$0xff] }
 0xc92   :  { %v2615_v7 = vpop.eup %2614 }
 0xc93   :  { %v856_v36 = vmul.f32 %v2615_v7, %v757_v6  ;;  %v185_v6 = vadd.f32 %v2850_v48, %v2848_v47 }
 0xcf7   :  { %v859_v37 = vpop.permute.xlu1 %858 }
 0xcf8   :  { %v861_v39 = vmul.f32 %v2615_v7, %v859_v37  ;;  %v1101_v7 = vld [vmem:[#allocation4 + $0xe8] sm:$0xff] }
 0xcf9   :  { %v2529_v37 = vpack.i.bf16 %v1101_v7, %v1100_v30 }
 0xcfa   :  { %863 = vrot.lane.b32.xlu0 %v861_v39, %s2717_s12  ;;  %v1104_v39 = vld [vmem:[#allocation4 + $0x100] sm:$0xff] }
 0xd6c   :  { %v864_v38 = vpop.permute.xlu0 %863 }
 0xd6d   :  { %v866_v40 = vadd.f32 %v864_v38, %v856_v36  ;;  %v1105_v36 = vld [vmem:[#allocation4 + $0x108] sm:$0xff]  ;;  %v2410_v38 = vpack.c.bf16 %v1094_v21, %v1092_v20 }
 0xd6f   :  { %2616 = vtanh.f32 %v866_v40 }
 0xd70   :  { %2618 = vpow2.f32 %v2054_v50  ;;  %v2718_v50 = vmov 0.0|0.0  }
 0xd71   :  { %2409 = vmatprep.subr.bf16.mxu1 %v2718_v50 }
 0xd72   :  { %2411 = vmatpush3.bf16.msra.mxu1 %v2410_v38 }
 0xd73   :  { %2412 = vmatprep.subr.bf16.mxu1 %v2718_v50 }
 0xd79   :  { %v2617_v49 = vpop.eup %2616 }
 0xd7a   :  { %869 = vrot.lane.b32.xlu1 %v2617_v49, %s2717_s12  ;;  %v2619_v51 = vpop.eup %2618  ;;  %v1098_v49 = vld [vmem:[#allocation4 + $0xd0] sm:$0xff] }
 0xd7b   :  { %v850_v52 = vadd.f32 1.0, %v2619_v51  ;;  %v2413_v51 = vpack.c.bf16 %v1098_v49, %v1096_v25 }
 0xd7d   :  { %2620 = vrcp.f32 %v850_v52  ;;  %v1102_v52 = vld [vmem:[#allocation4 + $0xf0] sm:$0xff]  ;;  %2414 = vmatpush3.bf16.msra.mxu1 %v2413_v51 }
 0xd7e   :  { %2415 = vmatprep.subr.bf16.mxu1 %v2718_v50 }
 0xd87   :  { %v2621_v53 = vpop.eup %2620 }
 0xdec   :  { %v870_v54 = vpop.permute.xlu1 %869 }
 0xded   :  { %v872_v55 = vmul.f32 %v2621_v53, %v870_v54  ;;  %v2416_v53 = vpack.c.bf16 %v1102_v52, %v1100_v30  ;;  %v1106_v54 = vld [vmem:[#allocation4 + $0x110] sm:$0xff] }
 0xdef   :  { %873 = vst.msk [vmem:[#allocation3 + $0x28] sm:$0xff] %vm3187_vm1, %v872_v55  ;;  %2055 = vmatmul.mubr.msk.f32.vlgmr.msra.gmra.mrb[12].mxu0 %vm3187_vm1, %v872_v55  ;;  %v2419_v55 = vpack.c.bf16 %v1106_v54, %v1104_v39  ;;  %2417 = vmatpush3.bf16.msra.mxu1 %v2416_v53  ;;  %v1109_v53 = vld [vmem:[#allocation3 + $0x8] sm:$0xff] }
 0xdf0   :  { %2396 = vmatpush1.bf16.msra.mxu0 %v2763_v10  ;;  %1052 = vmatprep.mubr.f32.mxu0 %v2716_v0  ;;  %v179_v10 = vadd.f32 %v2835_v43, %v2848_v47 }
 0xdf1   :  { %2398 = vmatprep.subr.bf16.mxu0 %v2770_v15  ;;  %2418 = vmatprep.subr.bf16.mxu1 %v2718_v50 }
 0xdf3   :  { %2420 = vmatpush3.bf16.msra.mxu1 %v2419_v55  ;;  %v1111_v55 = vld [vmem:[#allocation3 + $0x18] sm:$0xff] }
 0xdf4   :  { %2400 = vmatpush1.bf16.msra.mxu0 %v2773_v18 }
 0xdf5   :  { %2402 = vmatprep.subr.bf16.mxu0 %v2777_v19 }
 0xdf8   :  { %2404 = vmatpush1.bf16.msra.mxu0 %v2790_v26 }
 0xdf9   :  { %2406 = vmatprep.subr.bf16.mxu0 %v2794_v27 }
 0xdfc   :  { %2408 = vmatpush1.bf16.msra.mxu0 %v2804_v31 }
 0xec2   :  { %v945_v57 = vpop.f32.mrb[12].mxu0 }
 0xec3   :  { %v950_v58 = vadd.f32 %v945_v57, %v177_v56  ;;  %v947_v59 = vpop.f32.mrb[13].mxu0 }
 0xec4   :  { %v951_v15 = vadd.f32 %v947_v59, %v179_v10 }
 0xec5   :  { %v2056_v19 = vmul.f32 -1.442695, %v950_v58 }
 0xec6   :  { %2622 = vtanh.f32 %v951_v15  ;;  %v2057_v1 = vmul.f32 -1.442695, %v951_v15 }
 0xec7   :  { %2624 = vpow2.f32 %v2056_v19 }
 0xed0   :  { %v2623_v18 = vpop.eup %2622 }
 0xed1   :  { %967 = vrot.lane.b32.xlu0 %v2623_v18, %s2717_s12  ;;  %v2625_v26 = vpop.eup %2624 }
 0xed2   :  { %v958_v27 = vadd.f32 1.0, %v2625_v26 }
 0xed4   :  { %2626 = vrcp.f32 %v958_v27 }
 0xede   :  { %v2627_v31 = vpop.eup %2626 }
 0xedf   :  { %v965_v41 = vmul.f32 %v2627_v31, %v866_v40  ;;  %v2539_v40 = vpack.i.bf16 %v1105_v36, %v1104_v39 }
 0xf43   :  { %v968_v60 = vpop.permute.xlu0 %967 }
 0xf44   :  { %v970_v61 = vmul.f32 %v2627_v31, %v968_v60 }
 0xf46   :  { %972 = vrot.lane.b32.xlu1 %v970_v61, %s2717_s12 }
 0xfb8   :  { %v973_v43 = vpop.permute.xlu1 %972 }
 0xfb9   :  { %v2972_v62 = vadd.f32 %v973_v43, %v965_v41  ;;  %v1099_v41 = vld [vmem:[#allocation4 + $0xd8] sm:$0xff] }
 0xfbb   :  { %2628 = vtanh.f32 %v2972_v62 }
 0xfbc   :  { %2630 = vpow2.f32 %v2057_v1 }
 0xfc5   :  { %v2629_v63 = vpop.eup %2628 }
 0xfc6   :  { %978 = vrot.lane.b32.xlu0 %v2629_v63, %s2717_s12  ;;  %v2631_v2 = vpop.eup %2630  ;;  %v1103_v63 = vld [vmem:[#allocation4 + $0xf8] sm:$0xff] }
 0xfc7   :  { %v959_v3 = vadd.f32 1.0, %v2631_v2  ;;  %v2534_v1 = vpack.i.bf16 %v1103_v63, %v1102_v52  ;;  %v1107_v2 = vld [vmem:[#allocation4 + $0x118] sm:$0xff] }
 0xfc9   :  { %2632 = vrcp.f32 %v959_v3  ;;  %v2544_v3 = vpack.i.bf16 %v1107_v2, %v1106_v54  ;;  %v1110_v54 = vld [vmem:[#allocation3 + $0x10] sm:$0xff] }
 0xfd3   :  { %v2633_v4 = vpop.eup %2632 }
0x1038   :  { %v979_v5 = vpop.permute.xlu0 %978 }
0x1039   :  { %v981_v33 = vmul.f32 %v2633_v4, %v979_v5  ;;  %v1118_v4 = vsub.s32 1, %v2821_v35 }
0x103b   :  { %982 = vst.msk [vmem:[#allocation3 + $0x30] sm:$0xff] %vm3187_vm1, %v981_v33  ;;  %2058 = vmatmul.mubr.msk.f32.vlgmr.msra.gmra.mrb[14].mxu0 %vm3187_vm1, %v981_v33  ;;  %v3009_v5 = vrot.slane %v2833_v42, %v1118_v4  ;;  %v1196_v33 = vrot.slane %v2840_v44, %v1118_v4 }
0x110e   :  { %v1054_v8 = vpop.f32.mrb[14].mxu0 }
0x110f   :  { %v1059_v9 = vadd.f32 %v1054_v8, %v183_v34  ;;  %v1056_v11 = vpop.f32.mrb[15].mxu0 }
0x1110   :  { %v2982_v12 = vadd.f32 %v1056_v11, %v185_v6 }
0x1111   :  { %v2059_v14 = vmul.f32 -1.442695, %v1059_v9 }
0x1112   :  { %2634 = vtanh.f32 %v2982_v12  ;;  %v2060_v34 = vmul.f32 -1.442695, %v2982_v12  ;;  %v1108_v12 = vld [vmem:[#allocation3] sm:$0xff] }
0x1113   :  { %2636 = vpow2.f32 %v2059_v14 }
0x111c   :  { %v2635_v13 = vpop.eup %2634 }
0x111d   :  { %1076 = vrot.lane.b32.xlu1 %v2635_v13, %s2717_s12  ;;  %v2637_v16 = vpop.eup %2636 }
0x111e   :  { %v1067_v17 = vadd.f32 1.0, %v2637_v16 }
0x1120   :  { %2638 = vrcp.f32 %v1067_v17 }
0x1121   :  { %2510 = vrot.lane.b32.xlu1 %v2509_v46, %s2717_s12 }
0x112a   :  { %v2639_v47 = vpop.eup %2638 }
0x112b   :  { %v1074_v10 = vmul.f32 %v2639_v47, %v2972_v62  ;;  %v2524_v62 = vpack.i.bf16 %v1099_v41, %v1098_v49  ;;  %v2720_v41 = vmov 1.0|1.0  }
0x118f   :  { %v1077_v48 = vpop.permute.xlu1 %1076 }
0x1190   :  { %v1079_v23 = vmul.f32 %v2639_v47, %v1077_v48 }
0x1192   :  { %1081 = vrot.lane.b32.xlu0 %v1079_v23, %s2717_s12 }
0x1193   :  { %v2511_v56 = vpop.permute.xlu1 %2510 }
0x1194   :  { %v2513_v59 = vunpack.i.h.bf16 %v2511_v56  ;;  %v2512_v15 = vunpack.i.l.bf16 %v2511_v56  ;;  %v1112_v56 = vld [vmem:[#allocation3 + $0x20] sm:$0xff] }
0x1196   :  { %2515 = vrot.lane.b32.xlu0 %v2514_v24, %s2717_s12  ;;  %v1245_v27 = vsel %vm3187_vm1, %v2512_v15, %v2513_v59  ;;  %v1400_v15 = vadd.s32 8, %v2821_v35 }
0x119a   :  { %2520 = vrot.lane.b32.xlu0 %v2519_v29, %s2717_s12 }
0x119e   :  { %2530 = vrot.lane.b32.xlu0 %v2529_v37, %s2717_s12 }
0x11a2   :  { %2540 = vrot.lane.b32.xlu0 %v2539_v40, %s2717_s12 }
0x11a6   :  { %1263 = vrot.lane.b32.xlu0 %v3009_v5, %s2717_s12 }
0x1204   :  { %v1082_v57 = vpop.permute.xlu0 %1081 }
0x1205   :  { %v1084_v58 = vadd.f32 %v1082_v57, %v1074_v10  ;;  %v1113_v10 = vld [vmem:[#allocation3 + $0x28] sm:$0xff]  ;;  %v1114_v57 = vld [vmem:[#allocation3 + $0x30] sm:$0xff] }
0x1207   :  { %2640 = vtanh.f32 %v1084_v58 }
0x1208   :  { %v2516_v18 = vpop.permute.xlu0 %2515  ;;  %2642 = vpow2.f32 %v2060_v34 }
0x1209   :  { %v2518_v19 = vunpack.i.h.bf16 %v2516_v18  ;;  %v2517_v26 = vunpack.i.l.bf16 %v2516_v18 }
0x120b   :  { %v3000_v31 = vpack.c.bf16 %v2518_v19, %v2513_v59  ;;  %v1246_v60 = vsel %vm3187_vm1, %v2517_v26, %v2518_v19  ;;  %v3069_v59 = vand.u32 127, %v41_v32  ;;  %v1401_v26 = vadd.s32 16, %v2821_v35 }
0x120c   :  { %v2421_v61 = vpack.c.bf16 %v1246_v60, %v1245_v27  ;;  %v3016_v9 = vpop.permute.xlu0 %2520  ;;  %v1402_v60 = vadd.s32 24, %v2821_v35  ;;  %v1403_v32 = vadd.s32 32, %v2821_v35 }
0x120d   :  { %v2523_v44 = vunpack.i.h.bf16 %v3016_v9  ;;  %v2522_v16 = vunpack.i.l.bf16 %v3016_v9  ;;  %v1409_v18 = vmul.u32 16, %v3069_v59  ;;  %v1418_v19 = vadd.s32 1, %v3069_v59 }
0x120e   :  { %2422 = vmatprep.subr.bf16.mxu1 %v2421_v61 }
0x120f   :  { %v1247_v48 = vsel %vm3187_vm1, %v2522_v16, %v2523_v44  ;;  %vm1410_vm3 = vcmp.ge.s32.totalorder %v2821_v35, %v1409_v18  ;;  %v1419_v27 = vmul.u32 16, %v1418_v19  ;;  %vm1411_vm4 = vcmp.ge.s32.totalorder %v1400_v15, %v1409_v18 }
0x1210   :  { %v3018_v14 = vpop.permute.xlu0 %2530  ;;  %vm1412_vm8 = vcmp.ge.s32.totalorder %v1401_v26, %v1409_v18  ;;  %vm1413_vm11 = vcmp.ge.s32.totalorder %v1402_v60, %v1409_v18  ;;  %vm1414_vm15 = vcmp.ge.s32.totalorder %v1403_v32, %v1409_v18 }
0x1211   :  { %v2641_v43 = vpop.eup %2640  ;;  %v2533_v20 = vunpack.i.h.bf16 %v3018_v14  ;;  %v2532_v45 = vunpack.i.l.bf16 %v3018_v14  ;;  %vm1420_vm5 = vcmp.lt.s32.totalorder %v2821_v35, %v1419_v27  ;;  %vm1421_vm6 = vcmp.lt.s32.totalorder %v1400_v15, %v1419_v27 }
0x1212   :  { %1087 = vrot.lane.b32.xlu1 %v2641_v43, %s2717_s12  ;;  %v2643_v6 = vpop.eup %2642  ;;  %vm1428_vm7 = vmand %vm1410_vm3, %vm1420_vm5  ;;  %vm1422_vm9 = vcmp.lt.s32.totalorder %v1401_v26, %v1419_v27  ;;  %vm1423_vm12 = vcmp.lt.s32.totalorder %v1402_v60, %v1419_v27  ;;  %vm1424_vm0 = vcmp.lt.s32.totalorder %v1403_v32, %v1419_v27  ;;  %v1405_v43 = vadd.s32 48, %v2821_v35 }
0x1213   :  { %v1068_v8 = vadd.f32 1.0, %v2643_v6  ;;  %v1249_v25 = vsel %vm3187_vm1, %v2532_v45, %v2533_v20  ;;  %vm1429_vm10 = vmand %vm1411_vm4, %vm1421_vm6 }
0x1214   :  { %v3034_v21 = vpop.permute.xlu0 %2540  ;;  %vm2437_vm13 = vmpackc.low %vm1429_vm10, %vm1428_vm7  ;;  %vm1416_vm10 = vcmp.ge.s32.totalorder %v1405_v43, %v1409_v18 }
0x1215   :  { %2644 = vrcp.f32 %v1068_v8  ;;  %v2543_v30 = vunpack.i.h.bf16 %v3034_v21  ;;  %v2542_v7 = vunpack.i.l.bf16 %v3034_v21  ;;  %vm1430_vm14 = vmand %vm1412_vm8, %vm1422_vm9  ;;  %vm1426_vm9 = vcmp.lt.s32.totalorder %v1405_v43, %v1419_v27 }
0x1216   :  { %2525 = vrot.lane.b32.xlu1 %v2524_v62, %s2717_s12  ;;  %vm1431_vm2 = vmand %vm1413_vm11, %vm1423_vm12  ;;  %v1406_v62 = vadd.s32 56, %v2821_v35 }
0x1217   :  { %v1251_v49 = vsel %vm3187_vm1, %v2542_v7, %v2543_v30  ;;  %vm2441_vm5 = vmpackc.low %vm1431_vm2, %vm1430_vm14 }
0x1218   :  { %vm1432_vm4 = vmand %vm1414_vm15, %vm1424_vm0  ;;  %vm1417_vm8 = vcmp.ge.s32.totalorder %v1406_v62, %v1409_v18  ;;  %v1264_v2 = vpop.permute.xlu0 %1263 }
0x1219   :  { %vm1434_vm11 = vmand %vm1416_vm10, %vm1426_vm9  ;;  %vm1685_vm9 = vcmask 1043456  }
0x121a   :  { %2535 = vrot.lane.b32.xlu1 %v2534_v1, %s2717_s12 }
0x121e   :  { %2545 = vrot.lane.b32.xlu1 %v2544_v3, %s2717_s12 }
0x121f   :  { %v2645_v11 = vpop.eup %2644 }
0x1222   :  { %1265 = vrot.lane.b32.xlu1 %v1196_v33, %s2717_s12 }
0x1284   :  { %v1088_v13 = vpop.permute.xlu1 %1087 }
0x1285   :  { %v1090_v42 = vmul.f32 %v2645_v11, %v1088_v13 }
0x1287   :  { %1091 = vst.msk [vmem:[#allocation3 + $0x38] sm:$0xff] %vm3187_vm1, %v1090_v42  ;;  %2185 = vmatmul.mubr.msk.f32.vlgmr.msra.gmra.mrb[10].mxu1 %vm3187_vm1, %v1090_v42 }
0x1288   :  { %2424 = vmatpush3.bf16.msra.mxu1 %v2421_v61  ;;  %v3024_v17 = vpop.permute.xlu1 %2525  ;;  %2203 = vmatprep.mubr.msk.f32.mxu1 %vm3187_vm1, %v1108_v12  ;;  %v1404_v61 = vadd.s32 40, %v2821_v35 }
0x1289   :  { %v2528_v46 = vunpack.i.h.bf16 %v3024_v17  ;;  %v2527_v47 = vunpack.i.l.bf16 %v3024_v17 }
0x128a   :  { %vm1425_vm3 = vcmp.lt.s32.totalorder %v1404_v61, %v1419_v27 }
0x128b   :  { %v1248_v22 = vsel %vm3187_vm1, %v2527_v47, %v2528_v46 }
0x128c   :  { %v3039_v23 = vpop.permute.xlu1 %2535  ;;  %v2425_v24 = vpack.c.bf16 %v1248_v22, %v1247_v48 }
0x128d   :  { %v2538_v28 = vunpack.i.h.bf16 %v3039_v23  ;;  %v2537_v29 = vunpack.i.l.bf16 %v3039_v23 }
0x128e   :  { %2426 = vmatprep.subr.bf16.mxu1 %v2425_v24  ;;  %v1115_v58 = vld [vmem:[#allocation3 + $0x38] sm:$0xff] }
0x128f   :  { %2428 = vmatpush3.bf16.msra.mxu1 %v2425_v24  ;;  %v1250_v37 = vsel %vm3187_vm1, %v2537_v29, %v2538_v28 }
0x1290   :  { %v3051_v39 = vpop.permute.xlu1 %2545  ;;  %v2429_v36 = vpack.c.bf16 %v1250_v37, %v1249_v25 }
0x1291   :  { %v2548_v38 = vunpack.i.h.bf16 %v3051_v39  ;;  %v2547_v40 = vunpack.i.l.bf16 %v3051_v39 }
0x1292   :  { %2430 = vmatprep.subr.bf16.mxu1 %v2429_v36 }
0x1293   :  { %2432 = vmatpush3.bf16.msra.mxu1 %v2429_v36  ;;  %v1252_v51 = vsel %vm3187_vm1, %v2547_v40, %v2548_v38  ;;  %v2463_v9 = vpack.c.bf16 %v2548_v38, %v2543_v30 }
0x1294   :  { %v2433_v52 = vpack.c.bf16 %v1252_v51, %v1251_v49  ;;  %v3082_v3 = vpop.permute.xlu1 %1265 }
0x1296   :  { %2434 = vmatprep.subr.bf16.mxu1 %v2433_v52 }
0x1297   :  { %2436 = vmatpush3.bf16.msra.mxu1 %v2433_v52 }
0x1298   :  { %2438 = vmatprep.subr.msk.bf16.mxu1 %vm2437_vm13, %v2720_v41 }
0x129a   :  { %2204 = vmatmul.mubr.msk.f32.vlgmr.msra.gmra.mrb[12].mxu1 %vm3187_vm1, %v1109_v53 }
0x129b   :  { %2206 = vmatprep.mubr.msk.f32.mxu1 %vm3187_vm1, %v1110_v54  ;;  %2440 = vmatpush3.bf16.msk.msra.mxu1 %vm2437_vm13, %v2720_v41  ;;  %vm1427_vm13 = vcmp.lt.s32.totalorder %v1406_v62, %v1419_v27  ;;  %v1653_v54 = vmul.u32 16, %v2821_v35 }
0x129c   :  { %2442 = vmatprep.subr.msk.bf16.mxu1 %vm2441_vm5, %v2720_v41  ;;  %vm1435_vm12 = vmand %vm1417_vm8, %vm1427_vm13 }
0x129d   :  { %vm2449_vm2 = vmpackc.low %vm1435_vm12, %vm1434_vm11  ;;  %vm1654_vm10 = vcmp.ge.s32.totalorder %v3069_v59, %v1653_v54  ;;  %vm1589_vm11 = vcmask 31744   ;;  %vm3197_vm12 = vmmov 0  }
0x129e   :  { %2207 = vmatmul.mubr.msk.f32.gmra.mrb[14].mxu1 %vm3187_vm1, %v1111_v55  ;;  %v1655_v55 = vadd.s32 1, %v2821_v35 }
0x129f   :  { %2209 = vmatprep.mubr.msk.f32.mxu1 %vm3187_vm1, %v1112_v56  ;;  %2444 = vmatpush3.bf16.msk.msra.mxu1 %vm2441_vm5, %v2720_v41 }
0x12a0   :  { %v1656_v56 = vmul.u32 16, %v1655_v55 }
0x12a2   :  { %2210 = vmatmul.mubr.msk.f32.gmra.mrb[16].mxu1 %vm3187_vm1, %v1113_v10  ;;  %vm1657_vm8 = vcmp.lt.s32.totalorder %v3069_v59, %v1656_v56 }
0x12a3   :  { %2212 = vmatprep.mubr.msk.f32.mxu1 %vm3187_vm1, %v1114_v57  ;;  %vm1658_vm13 = vmand %vm1654_vm10, %vm1657_vm8  ;;  %vm2013_vm8 = vcmask 57344  }
0x12a4   :  { %v2094_v10 = vsel %vm1658_vm13, 1.0, %v2716_v0 }
0x12a6   :  { %2213 = vmatmul.mubr.msk.f32.gmra.mrb[18].mxu1 %vm3187_vm1, %v1115_v58  ;;  %vm1415_vm1 = vcmp.ge.s32.totalorder %v1404_v61, %v1409_v18 }
0x12a7   :  { %vm1433_vm6 = vmand %vm1415_vm1, %vm1425_vm3  ;;  %vm3188_vm1 = vcmask 523264  }
0x12a8   :  { %vm2445_vm7 = vmpackc.low %vm1433_vm6, %vm1432_vm4  ;;  %v1267_v4 = vsel %vm3188_vm1, %v1264_v2, %v3082_v3 }
0x12a9   :  { %2446 = vmatprep.subr.msk.bf16.mxu1 %vm2445_vm7, %v2720_v41  ;;  %vm3189_vm14 = vmmov %vm3188_vm1 }
0x12aa   :  { %2448 = vmatpush3.bf16.msk.msra.mxu1 %vm2445_vm7, %v2720_v41  ;;  %vm3190_vm15 = vmmov %vm3188_vm1 }
0x12ab   :  { %2450 = vmatprep.subr.msk.bf16.mxu1 %vm2449_vm2, %v2720_v41  ;;  %vm3191_vm0 = vmmov %vm3188_vm1 }
0x12ac   :  { %vm3192_vm3 = vmmov %vm3191_vm0 }
0x12ad   :  { %vm3193_vm5 = vmmov %vm3191_vm0 }
0x12ae   :  { %2452 = vmatpush3.bf16.msk.msra.mxu1 %vm2449_vm2, %v2720_v41  ;;  %vm3194_vm4 = vmmov %vm3191_vm0 }
0x12af   :  { %vm3195_vm6 = vmmov %vm3191_vm0  ;;  %2243 = vmatprep.subr.msk.mxu1 %vm1685_vm9, %v2094_v10 }
0x12b0   :  { %vm3196_vm7 = vmmov %vm3191_vm0 }
0x12b1   :  { %vm3198_vm2 = vmmov %vm3191_vm0 }
0x12b2   :  { %vm3199_vm1 = vmmov %vm3191_vm0 }
0x12b3   :  { %vm3207_vm10 = vmmov %vm3191_vm0 }
0x135a   :  { %v1189_v63 = vpop.f32.mrb[10].mxu1 }
0x135b   :  { %v2186_v1 = vpop.f32.mrb[11].mxu1  ;;  %v1190_v34 = vadd.f32 %v1189_v63, %v3009_v5 }
0x136d   :  { %v2205_v33 = vpop.f32.mrb[12].mxu1 }
0x136e   :  { %v1365_v6 = vadd.f32 %v2205_v33, %v1267_v4  ;;  %v1359_v8 = vpop.f32.mrb[13].mxu1 }
0x136f   :  { %v1360_v11 = vadd.f32 %v1359_v8, %v1267_v4 }
0x1370   :  { %v1453_v13 = vmul.f32 %v1365_v6, %v1190_v34  ;;  %1804 = vrot.lane.b32.xlu1 %v1365_v6, %s2717_s12 }
0x1371   :  { %v1452_v42 = vmul.f32 %v1360_v11, %v1190_v34  ;;  %v2208_v16 = vpop.f32.mrb[14].mxu1  ;;  %1802 = vrot.lane.b32.xlu0 %v1360_v11, %s2717_s12 }
0x1372   :  { %v1375_v12 = vadd.f32 %v2208_v16, %v1267_v4  ;;  %v1369_v45 = vpop.f32.mrb[15].mxu1 }
0x1373   :  { %v1370_v47 = vadd.f32 %v1369_v45, %v1267_v4  ;;  %2231 = vmatprep.mubr.msk.f32.mxu1 %vm3189_vm14, %v1452_v42  ;;  %vm3200_vm14 = vmmov %vm3191_vm0 }
0x1374   :  { %v1455_v48 = vmul.f32 %v1375_v12, %v1190_v34  ;;  %1808 = vrot.lane.b32.xlu1 %v1375_v12, %s2717_s12  ;;  %2232 = vmatmul.mubr.msk.f32.vlgmr.msra.gmra.mrb[20].mxu1 %vm3190_vm15, %v1453_v13  ;;  %vm3201_vm15 = vmmov %vm3191_vm0 }
0x1375   :  { %v1454_v5 = vmul.f32 %v1370_v47, %v1190_v34  ;;  %v2211_v22 = vpop.f32.mrb[16].mxu1  ;;  %1806 = vrot.lane.b32.xlu0 %v1370_v47, %s2717_s12  ;;  %2244 = vmatpush3.msk.msra.mxu1 %vm1685_vm9, %v2094_v10 }
0x1376   :  { %v1385_v24 = vadd.f32 %v2211_v22, %v1267_v4  ;;  %v1379_v25 = vpop.f32.mrb[17].mxu1  ;;  %2453 = vmatprep.subr.bf16.mxu1 %v2718_v50 }
0x1377   :  { %v1380_v29 = vadd.f32 %v1379_v25, %v1267_v4  ;;  %2234 = vmatprep.mubr.msk.f32.mxu1 %vm3191_vm0, %v1454_v5 }
0x1378   :  { %v1457_v7 = vmul.f32 %v1385_v24, %v1190_v34  ;;  %1812 = vrot.lane.b32.xlu1 %v1385_v24, %s2717_s12  ;;  %2235 = vmatmul.mubr.msk.f32.gmra.mrb[22].mxu1 %vm3192_vm3, %v1455_v48  ;;  %vm3202_vm3 = vmmov %vm3191_vm0 }
0x1379   :  { %v1456_v37 = vmul.f32 %v1380_v29, %v1190_v34  ;;  %v2214_v36 = vpop.f32.mrb[18].mxu1  ;;  %1810 = vrot.lane.b32.xlu0 %v1380_v29, %s2717_s12 }
0x137a   :  { %v1395_v40 = vadd.f32 %v2214_v36, %v1267_v4  ;;  %v1389_v49 = vpop.f32.mrb[19].mxu1 }
0x137b   :  { %v1390_v51 = vadd.f32 %v1389_v49, %v1267_v4  ;;  %2237 = vmatprep.mubr.msk.f32.mxu1 %vm3193_vm5, %v1456_v37  ;;  %vm3203_vm5 = vmmov %vm3191_vm0 }
0x137c   :  { %v1459_v52 = vmul.f32 %v1395_v40, %v1190_v34  ;;  %1816 = vrot.lane.b32.xlu1 %v1395_v40, %s2717_s12  ;;  %2238 = vmatmul.mubr.msk.f32.gmra.mrb[24].mxu1 %vm3194_vm4, %v1457_v7  ;;  %vm3204_vm4 = vmmov %vm3191_vm0 }
0x137d   :  { %v1458_v53 = vmul.f32 %v1390_v51, %v1190_v34  ;;  %1814 = vrot.lane.b32.xlu0 %v1390_v51, %s2717_s12 }
0x137f   :  { %2240 = vmatprep.mubr.msk.f32.mxu1 %vm3195_vm6, %v1458_v53  ;;  %vm3205_vm6 = vmmov %vm3191_vm0 }
0x1380   :  { %2241 = vmatmul.mubr.msk.f32.gmra.mrb[26].mxu1 %vm3196_vm7, %v1459_v52  ;;  %vm3206_vm7 = vmmov %vm3191_vm0 }
0x13e2   :  { %v1805_v14 = vpop.permute.xlu1 %1804 }
0x13e6   :  { %v1809_v17 = vpop.permute.xlu1 %1808 }
0x1447   :  { %v2233_v57 = vpop.f32.mrb[20].mxu1 }
0x1448   :  { %v1550_v58 = vpop.f32.mrb[21].mxu1  ;;  %v1591_v35 = vsel %vm1589_vm11, %v2233_v57, -inf }
0x1449   :  { %v1590_v59 = vsel %vm1589_vm11, %v1550_v58, -inf }
0x144b   :  { %v2236_v15 = vpop.f32.mrb[22].mxu1 }
0x144c   :  { %v1560_v18 = vpop.f32.mrb[23].mxu1  ;;  %v1593_v43 = vsel %vm1589_vm11, %v2236_v15, -inf }
0x144d   :  { %v1592_v2 = vsel %vm1589_vm11, %v1560_v18, -inf }
0x144f   :  { %v2239_v19 = vpop.f32.mrb[24].mxu1 }
0x1450   :  { %v1596_v26 = vsel %vm1589_vm11, %v2239_v19, -inf  ;;  %v1570_v27 = vpop.f32.mrb[25].mxu1 }
0x1451   :  { %v1597_v60 = vmax.f32 %v1591_v35, %v1596_v26  ;;  %v1594_v32 = vsel %vm1589_vm11, %v1570_v27, -inf }
0x1452   :  { %v1595_v61 = vmax.f32 %v1590_v59, %v1594_v32 }
0x1453   :  { %v2242_v41 = vpop.f32.mrb[26].mxu1 }
0x1454   :  { %v1602_v62 = vmax.f32 %v1595_v61, %v1597_v60  ;;  %v1600_v63 = vsel %vm1589_vm11, %v2242_v41, -inf  ;;  %v1580_v1 = vpop.f32.mrb[27].mxu1 }
0x1455   :  { %v1601_v4 = vmax.f32 %v1593_v43, %v1600_v63  ;;  %v1598_v33 = vsel %vm1589_vm11, %v1580_v1, -inf }
0x1456   :  { %v1599_v34 = vmax.f32 %v1592_v2, %v1598_v33 }
0x1458   :  { %v1603_v6 = vmax.f32 %v1599_v34, %v1601_v4 }
0x145a   :  { %v1604_v8 = vmax.f32 %v1602_v62, %v1603_v6 }
0x145c   :  { %v1605_v11 = vsub.f32 %v1550_v58, %v1604_v8  ;;  %v1606_v13 = vsub.f32 %v2233_v57, %v1604_v8  ;;  %v1607_v42 = vsub.f32 %v1560_v18, %v1604_v8  ;;  %v1608_v16 = vsub.f32 %v2236_v15, %v1604_v8 }
0x145d   :  { %v1609_v12 = vsub.f32 %v1570_v27, %v1604_v8  ;;  %v1610_v45 = vsub.f32 %v2239_v19, %v1604_v8  ;;  %v1611_v47 = vsub.f32 %v1580_v1, %v1604_v8  ;;  %v1612_v48 = vsub.f32 %v2242_v41, %v1604_v8 }
0x145e   :  { %v1613_v5 = vmul.f32 1.442695, %v1605_v11  ;;  %v1615_v22 = vmul.f32 1.442695, %v1606_v13  ;;  %v1617_v24 = vmul.f32 1.442695, %v1607_v42  ;;  %v2457_v11 = vpack.c.bf16 %v2528_v46, %v2523_v44  ;;  %v1803_v44 = vpop.permute.xlu0 %1802  ;;  %v1813_v42 = vpop.permute.xlu1 %1812 }
0x145f   :  { %v1619_v25 = vmul.f32 1.442695, %v1608_v16  ;;  %v1621_v29 = vmul.f32 1.442695, %v1609_v12  ;;  %v1623_v7 = vmul.f32 1.442695, %v1610_v45 }
0x1460   :  { %2646 = vpow2.f32 %v1613_v5  ;;  %v1625_v37 = vmul.f32 1.442695, %v1611_v47  ;;  %v1627_v36 = vmul.f32 1.442695, %v1612_v48 }
0x1461   :  { %2648 = vpow2.f32 %v1615_v22 }
0x1462   :  { %2650 = vpow2.f32 %v1617_v24  ;;  %v1807_v46 = vpop.permute.xlu0 %1806 }
0x1463   :  { %2652 = vpow2.f32 %v1619_v25 }
0x1464   :  { %2654 = vpow2.f32 %v1621_v29 }
0x1465   :  { %2656 = vpow2.f32 %v1623_v7 }
0x1466   :  { %2658 = vpow2.f32 %v1625_v37  ;;  %v1811_v45 = vpop.permute.xlu0 %1810  ;;  %v1817_v37 = vpop.permute.xlu1 %1816 }
0x1467   :  { %2660 = vpow2.f32 %v1627_v36 }
0x146a   :  { %v2647_v40 = vpop.eup %2646 }
0x146b   :  { %v2649_v49 = vpop.eup %2648  ;;  %v1629_v51 = vsel %vm1589_vm11, %v2647_v40, 0.0 }
0x146c   :  { %v2651_v52 = vpop.eup %2650  ;;  %v1630_v53 = vsel %vm1589_vm11, %v2649_v49, 0.0 }
0x146d   :  { %v2653_v54 = vpop.eup %2652  ;;  %v1631_v55 = vadd.f32 %v1630_v53, %v1629_v51  ;;  %v1632_v56 = vsel %vm1589_vm11, %v2651_v52, 0.0 }
0x146e   :  { %v2655_v10 = vpop.eup %2654  ;;  %v1634_v58 = vsel %vm1589_vm11, %v2653_v54, 0.0 }
0x146f   :  { %v1633_v57 = vadd.f32 %v1632_v56, %v1631_v55  ;;  %v2657_v15 = vpop.eup %2656  ;;  %v1636_v19 = vsel %vm1589_vm11, %v2655_v10, 0.0 }
0x1470   :  { %v2659_v35 = vpop.eup %2658  ;;  %v1638_v27 = vsel %vm1589_vm11, %v2657_v15, 0.0 }
0x1471   :  { %v1635_v18 = vadd.f32 %v1634_v58, %v1633_v57  ;;  %v2661_v59 = vpop.eup %2660  ;;  %v1640_v32 = vsel %vm1589_vm11, %v2659_v35, 0.0 }
0x1472   :  { %v1642_v41 = vsel %vm1589_vm11, %v2661_v59, 0.0 }
0x1473   :  { %v1637_v26 = vadd.f32 %v1636_v19, %v1635_v18  ;;  %v2721_v18 = vmov 0   ;;  %v2664_v19 = vld [vmem:[%s3183_s2] sm:$0xff]  ;;  %s2687_s2 = scalar_lea.vmem %s2022_s21, 16 }
0x1474   :  { %2549 = vset.pattern.permute.xlu0 %v2721_v18  ;;  %p2688_p8 = scmp.ne.s32.totalorder %s2022_s21, %s2687_s2  ;;  %p2693_p10 = scmp.lt.s32.totalorder %s2691_s22, %s2687_s2 }
0x1475   :  { %v1639_v60 = vadd.f32 %v1638_v27, %v1637_v26  ;;  %1933 = vperm.xlu0 %2549, %v2664_v19  }
0x1476   :  { %p2694_p11 = por %p2693_p10, %p2692_p9 }
0x1477   :  { %v1641_v61 = vadd.f32 %v1640_v32, %v1639_v60 }
0x1478   :  { %p2695_p12 = pnand %p2694_p11, %p2688_p8 }
0x1479   :  { %v1643_v43 = vadd.f32 %v1642_v41, %v1641_v61 }
0x147b   :  { %2662 = vrcp.f32 %v1643_v43 }
0x1485   :  { %v2663_v62 = vpop.eup %2662 }
0x1486   :  { %v1645_v63 = vmul.f32 %v2663_v62, %v2647_v40  ;;  %v1646_v1 = vmul.f32 %v2663_v62, %v2649_v49  ;;  %v1647_v2 = vmul.f32 %v2663_v62, %v2651_v52  ;;  %v1648_v4 = vmul.f32 %v2663_v62, %v2653_v54  ;;  %v1815_v49 = vpop.permute.xlu0 %1814 }
0x1487   :  { %v1649_v33 = vmul.f32 %v2663_v62, %v2655_v10  ;;  %v1650_v34 = vmul.f32 %v2663_v62, %v2657_v15  ;;  %v1651_v6 = vmul.f32 %v2663_v62, %v2659_v35  ;;  %v1652_v8 = vmul.f32 %v2663_v62, %v2661_v59 }
0x1488   :  { %2245 = vmatprep.mubr.msk.f32.mxu1 %vm1589_vm11, %v1645_v63  ;;  %v1935_v59 = vrot.slane %v2664_v19, 2 }
0x1489   :  { %2246 = vmatmul.mubr.msk.f32.vlgmr.msra.gmra.mrb[28].mxu1 %vm1589_vm11, %v1646_v1 }
0x148a   :  { %2455 = vmatpush3.bf16.msra.mxu1 %v3000_v31  ;;  %2248 = vmatprep.mubr.msk.f32.mxu1 %vm1589_vm11, %v1647_v2  ;;  %v2460_v31 = vpack.c.bf16 %v2538_v28, %v2533_v20 }
0x148b   :  { %2456 = vmatprep.subr.bf16.mxu1 %v2718_v50 }
0x148d   :  { %2249 = vmatmul.mubr.msk.f32.gmra.mrb[30].mxu1 %vm1589_vm11, %v1648_v4 }
0x148e   :  { %2458 = vmatpush3.bf16.msra.mxu1 %v2457_v11  ;;  %2251 = vmatprep.mubr.msk.f32.mxu1 %vm1589_vm11, %v1649_v33 }
0x148f   :  { %2459 = vmatprep.subr.bf16.mxu1 %v2718_v50 }
0x1491   :  { %2252 = vmatmul.mubr.msk.f32.gmra.mrb[32].mxu1 %vm1589_vm11, %v1650_v34 }
0x1492   :  { %2461 = vmatpush3.bf16.msra.mxu1 %v2460_v31  ;;  %2254 = vmatprep.mubr.msk.f32.mxu1 %vm1589_vm11, %v1651_v6 }
0x1493   :  { %2462 = vmatprep.subr.bf16.mxu1 %v2718_v50 }
0x1495   :  { %2255 = vmatmul.mubr.msk.f32.gmra.mrb[34].mxu1 %vm1589_vm11, %v1652_v8 }
0x1496   :  { %2464 = vmatpush3.bf16.msra.mxu1 %v2463_v9  ;;  %2273 = vmatprep.mubr.msk.f32.mxu1 %vm3197_vm12, %v2716_v0 }
0x1497   :  { %2276 = vmatprep.subr.mxu1 %v2716_v0 }
0x14f4   :  { %v1934_v60 = vpop.permute.xlu0 %1933 }
0x14f5   :  { %v1936_v32 = vrot.slane %v1934_v60, 3 }
0x155c   :  { %v2247_v20 = vpop.f32.mrb[28].mxu1 }
0x155d   :  { %v1827_v23 = vmul.f32 %v2247_v20, %v1805_v14  ;;  %v1755_v50 = vpop.f32.mrb[29].mxu1 }
0x155e   :  { %v1826_v28 = vmul.f32 %v1803_v44, %v1755_v50 }
0x155f   :  { %v1835_v21 = vsel %vm3198_vm2, %v1827_v23, 0.0 }
0x1560   :  { %v1834_v30 = vsel %vm3199_vm1, %v1826_v28, 0.0  ;;  %v2250_v39 = vpop.f32.mrb[30].mxu1 }
0x1561   :  { %v1836_v38 = vadd.f32 %v1835_v21, %v1834_v30  ;;  %v1765_v13 = vpop.f32.mrb[31].mxu1  ;;  %v1829_v16 = vmul.f32 %v2250_v39, %v1809_v17 }
0x1562   :  { %v1828_v12 = vmul.f32 %v1807_v46, %v1765_v13 }
0x1563   :  { %v1839_v24 = vsel %vm3201_vm15, %v1829_v16, 0.0 }
0x1564   :  { %v1837_v47 = vsel %vm3200_vm14, %v1828_v12, 0.0  ;;  %v2253_v48 = vpop.f32.mrb[32].mxu1 }
0x1565   :  { %v1838_v5 = vadd.f32 %v1837_v47, %v1836_v38  ;;  %v1775_v22 = vpop.f32.mrb[33].mxu1  ;;  %v1831_v25 = vmul.f32 %v2253_v48, %v1813_v42 }
0x1566   :  { %v1830_v29 = vmul.f32 %v1811_v45, %v1775_v22 }
0x1567   :  { %v1840_v7 = vadd.f32 %v1839_v24, %v1838_v5  ;;  %v1843_v53 = vsel %vm3202_vm3, %v1831_v25, 0.0 }
0x1568   :  { %v1841_v36 = vsel %vm3191_vm0, %v1830_v29, 0.0  ;;  %v2256_v40 = vpop.f32.mrb[34].mxu1 }
0x1569   :  { %v1842_v51 = vadd.f32 %v1841_v36, %v1840_v7  ;;  %v1785_v52 = vpop.f32.mrb[35].mxu1  ;;  %v1833_v54 = vmul.f32 %v2256_v40, %v1817_v37 }
0x156a   :  { %v1832_v55 = vmul.f32 %v1815_v49, %v1785_v52 }
0x156b   :  { %v1844_v56 = vadd.f32 %v1843_v53, %v1842_v51  ;;  %v1847_v58 = vsel %vm3204_vm4, %v1833_v54, 0.0 }
0x156c   :  { %v1845_v10 = vsel %vm3203_vm5, %v1832_v55, 0.0 }
0x156d   :  { %v1846_v57 = vadd.f32 %v1845_v10, %v1844_v56 }
0x156f   :  { %v1848_v15 = vadd.f32 %v1847_v58, %v1846_v57 }
0x1571   :  { %2274 = vmatmul.mubr.msk.f32.vlgmr.msra.gmra.mrb[36].mxu1 %vm3205_vm6, %v1848_v15 }
0x1572   :  { %2278 = vmatprep.mubr.msk.f32.mxu1 %vm3197_vm12, %v2716_v0 }
0x1644   :  { %v1927_v35 = vpop.f32.mrb[36].mxu1 }
0x1645   :  { %v1928_v26 = vadd.f32 %v1927_v35, %v3082_v3  ;;  %v2275_v27 = vpop.f32.mrb[37].mxu1 }
0x1647   :  { %2277 = vmatpush3.xpose.msk.msra.mxu1 %vm3206_vm7, %v1928_v26 }
0x164a   :  { %2279 = vmatmul.mubr.msk.f32.vlgmr.msra.gmra.mrb[38].mxu1 %vm3207_vm10, %v1935_v59 }
0x171d   :  { %v2009_v0 = vpop.f32.mrb[38].mxu1 }
0x171e   :  { %v2010_v61 = vadd.f32 %v2009_v0, %v1936_v32  ;;  %v2280_v41 = vpop.f32.mrb[39].mxu1 }
0x1720   :  { %2014 = vst.msk [vmem:[#allocation7] sm:$0x1] %vm2013_vm8, %v2010_v61 }
0x1721   :  { %2698 = shalt.err (!%p2695_p12)
}
0x1722   :  { %s2699_s25 = scalar_lea.hbm %s3184_s3, 16 }
0x1723   :  { %p2700_p13 = scmp.ne.s32.totalorder %s3184_s3, %s2699_s25  ;;  %p2703_p0 = scmp.lt.u32.totalorder %s2699_s25, %s3184_s3 }
0x1725   :  { %p2705_p1 = pnand %p2703_p0, %p2700_p13 }
0x1727   :  { %2708 = shalt.err (!%p2705_p1)
}
0x1728   :  { %2024 = dma.vmem_to_hbm [thread:$0]  %s2022_s21, 16, %s3184_s3, [#allocation6]  }
0x1729   :  { %2711 = dma.done.wait [#allocation6], 16  }
0x172a   :  { %2712 = vsyncadd [#allocation6], 4294967280 }
0x172b   :  { %2028 = vsyncpa [#allocation5], 1 }
0x172c   :  { %2029 = vsyncpa [#allocation6], 1 }

</bundles_post_ra>
